<compile_context>
chip_gen: v7x
topology: tpu7x:2x2x1
jax: 0.10.0
libtpu: 0.0.40
codegen_flags: <defaults>
</compile_context>

<pallas_src>
import functools

import jax
import jax.numpy as jnp
from jax.experimental import pallas as pl
from jax.experimental.pallas import tpu as pltpu

_V_PAD = 128                 # lane padding so the fused V column keeps the output lane-dense
_BETA_MU_EPSILON = 0.01


def _policy_kernel(n_flat,
                   canv_ref,                # (tm, n_flat)
                   op_rows_ref,             # (tm, 2*n_hidden)  gathered op rows of [W1|WV]
                   w1v_ref, b1v_ref,        # (n_flat, 2*n_hidden), (1, 2*n_hidden)
                   whead_ref, bhead_ref,    # (2*n_hidden, L),      (1, L);  L = 2*n_flat + 128
                   out_ref):                # (tm, L)  ->  [mu | sigma | V, pad]
    # Fused first layer [layer_1 | layer_V]; the op one-hot contribution is the
    # pre-gathered weight row, added in f32 after the dot.
    z = jnp.dot(canv_ref[...], w1v_ref[...], preferred_element_type=jnp.float32)
    z = jnp.maximum(z + op_rows_ref[...] + b1v_ref[...], 0.0)        # ReLU, (tm, 2*n_hidden)

    # Fused heads + value head: [[Wmu|Wsig|0],[0|0|Wv_pad]].  sigma's "-5.0" and
    # the value bias are folded into bhead.
    raw = jnp.dot(z, whead_ref[...], preferred_element_type=jnp.float32) + bhead_ref[...]

    s = jax.nn.sigmoid(raw)                                          # EUP, one pass
    mu_like = _BETA_MU_EPSILON + (1.0 - 2.0 * _BETA_MU_EPSILON) * s
    lane = jax.lax.broadcasted_iota(jnp.int32, raw.shape, 1)
    # lanes [0, n_flat): mu affine; [n_flat, 2*n_flat): sigma; >= 2*n_flat: raw (V + pad).
    out_ref[...] = jnp.where(lane < n_flat, mu_like,
                             jnp.where(lane < 2 * n_flat, s, raw))


def policy_nn_canvas_1_forward_batched(canvs, op_idxs, packed_params, *, tm=128):
    """Batched forward.

    canvs:   (B, N_side, N_side) float32
    op_idxs: (B,) int32 (index of the one-hot op)
    Returns (mu (B, N_side, N_side), sigma (B, N_side, N_side), V (B, 1)).
    tm: rows per grid step; 128 works on all gens, use 256 on v6e/v7x.
    """
    w1v, w_op, b1v, w_heads, b_heads = packed_params
    B, n_side, _ = canvs.shape
    n_flat = n_side * n_side
    two_hidden = w1v.shape[1]
    L = w_heads.shape[1]                       # 2*n_flat + _V_PAD

    canv2d = canvs.reshape(B, n_flat).astype(jnp.float32)
    # Gather the op rows of [W1|WV] in XLA (clip guards out-of-range indices).
    op_idxs = jnp.clip(jnp.asarray(op_idxs, jnp.int32), 0, w_op.shape[0] - 1)
    op_rows = jnp.take(w_op, op_idxs, axis=0)                         # (B, 2*n_hidden)

    if B < tm:
        tm = B                                 # full-extent row block (no padding waste)
    b_pad = pl.cdiv(B, tm) * tm
    if b_pad != B:
        canv2d = jnp.pad(canv2d, ((0, b_pad - B), (0, 0)))
        op_rows = jnp.pad(op_rows, ((0, b_pad - B), (0, 0)))

    grid = (b_pad // tm,)

    flops = b_pad * (2 * n_flat * two_hidden + 2 * two_hidden * L + 6 * L)
    bytes_accessed = 4 * (w1v.size + b1v.size + w_heads.size + b_heads.size
                          + b_pad * (n_flat + two_hidden + L))
    cost = pl.CostEstimate(flops=flops, transcendentals=b_pad * L,
                           bytes_accessed=bytes_accessed)

    out = pl.pallas_call(
        functools.partial(_policy_kernel, n_flat),
        grid=grid,
        in_specs=[
            pl.BlockSpec((tm, n_flat), lambda i: (i, 0)),             # canvas rows
            pl.BlockSpec((tm, two_hidden), lambda i: (i, 0)),         # gathered op rows
            pl.BlockSpec(w1v.shape, lambda i: (0, 0)),                # W1 || WV    (resident)
            pl.BlockSpec(b1v.shape, lambda i: (0, 0)),                # b1 || bV    (resident)
            pl.BlockSpec(w_heads.shape, lambda i: (0, 0)),            # fused heads (resident)
            pl.BlockSpec(b_heads.shape, lambda i: (0, 0)),            # fused bias  (resident)
        ],
        out_specs=pl.BlockSpec((tm, L), lambda i: (i, 0)),            # mu | sigma | V
        out_shape=jax.ShapeDtypeStruct((b_pad, L), jnp.float32),
        compiler_params=pltpu.CompilerParams(
            dimension_semantics=("parallel",)),                       # both TCs on v7x
        cost_estimate=cost,
    )(canv2d, op_rows, w1v, b1v, w_heads, b_heads)

    mu = out[:B, :n_flat].reshape(B, n_side, n_side)
    sigma = out[:B, n_flat:2 * n_flat].reshape(B, n_side, n_side)
    v = out[:B, 2 * n_flat:2 * n_flat + 1]                            # (B, 1)
    return mu, sigma, v


def policy_nn_canvas_1_forward(canv, op_idx, packed_params):
    """Single-sample forward matching the PyTorch module's output dict."""
    mu, sigma, v = policy_nn_canvas_1_forward_batched(
        canv[None, ...], jnp.asarray(op_idx, jnp.int32).reshape(1), packed_params)
    return {'canv_1_mu': mu[0], 'canv_1_sigma': sigma[0], 'V_canv_1': v}   # V is (1,1)


# ----------------------------------------------------------------------------
# Parameter construction / packing
# ----------------------------------------------------------------------------
def _init_linear(key, in_features, out_features):
    """nn.Linear-style init (uniform +-1/sqrt(in)); W pre-transposed to (in, out)."""
    kw, kb = jax.random.split(key)
    bound = 1.0 / (in_features ** 0.5)
    w = jax.random.uniform(kw, (in_features, out_features), jnp.float32, -bound, bound)
    b = jax.random.uniform(kb, (1, out_features), jnp.float32, -bound, bound)
    return w, b


def make_raw_params(key, n_side, n_ops, n_hidden):
    n_flat = n_side * n_side
    n_in = n_flat + n_ops
    keys = jax.random.split(key, 5)
    w1, b1 = _init_linear(keys[0], n_in, n_hidden)        # layer_1
    wv, bv = _init_linear(keys[1], n_in, n_hidden)        # layer_V
    wmu, bmu = _init_linear(keys[2], n_hidden, n_flat)    # canv_out_1_mu
    wsig, bsig = _init_linear(keys[3], n_hidden, n_flat)  # canv_out_1_sigma
    wval, bval = _init_linear(keys[4], n_hidden, 1)       # V_canv_1
    return (w1, b1, wv, bv, wmu, bmu, wsig, bsig, wval, bval)


def pack_params(raw_params):
    """Fuse the Linear layers into lane-dense slabs for the kernel."""
    w1, b1, wv, bv, wmu, bmu, wsig, bsig, wval, bval = raw_params
    n_hidden = w1.shape[1]
    n_flat = wmu.shape[1]

    # Fused first layer [W1 | WV]; split canvas rows from op (one-hot) rows so the
    # op contribution can be a wrapper-side gather instead of an in-kernel select.
    w1v_full = jnp.concatenate([w1, wv], axis=1)                      # (n_in, 2*n_hidden)
    w1v = w1v_full[:n_flat]                                           # (n_flat, 2*n_hidden)
    w_op = w1v_full[n_flat:]                                          # (n_ops, 2*n_hidden)
    b1v = jnp.concatenate([b1, bv], axis=1)                           # (1, 2*n_hidden)

    # Fused heads + value: [[Wmu | Wsig | 0], [0 | 0 | Wv_padded]].
    top = jnp.concatenate([wmu, wsig, jnp.zeros((n_hidden, _V_PAD), jnp.float32)], axis=1)
    wval_pad = jnp.concatenate([wval, jnp.zeros((n_hidden, _V_PAD - 1), jnp.float32)], axis=1)
    bottom = jnp.concatenate([jnp.zeros((n_hidden, 2 * n_flat), jnp.float32), wval_pad], axis=1)
    w_heads = jnp.concatenate([top, bottom], axis=0)                  # (2*n_hidden, 2*n_flat+128)
    b_heads = jnp.concatenate([bmu, bsig - 5.0, bval,
                               jnp.zeros((1, _V_PAD - 1), jnp.float32)], axis=1)
    return (w1v, w_op, b1v, w_heads, b_heads)


def reference_forward(canv, op_idx, raw_params, n_ops):
    """Pure-JAX f32 reference of the PyTorch forward (default config)."""
    w1, b1, wv, bv, wmu, bmu, wsig, bsig, wval, bval = raw_params
    hi = jax.lax.Precision.HIGHEST
    op_ohe = jax.nn.one_hot(op_idx, n_ops, dtype=jnp.float32)
    inp = jnp.concatenate([canv.reshape(1, -1), op_ohe.reshape(1, -1)], axis=1)
    x = jnp.maximum(jnp.dot(inp, w1, precision=hi) + b1, 0.0)
    y = jnp.maximum(jnp.dot(inp, wv, precision=hi) + bv, 0.0)
    mu = 0.01 + 0.98 * jax.nn.sigmoid(jnp.dot(x, wmu, precision=hi) + bmu)
    sigma = jax.nn.sigmoid(jnp.dot(x, wsig, precision=hi) + bsig - 5.0)
    v = jnp.dot(y, wval, precision=hi) + bval
    n_side = canv.shape[0]
    return mu.reshape(n_side, n_side), sigma.reshape(n_side, n_side), v


if __name__ == "__main__":
    N_side, N_ops, N_hidden = 16, 8, 32
    B = 256                                        # two 128-row grid steps

    key = jax.random.PRNGKey(0)
    k_params, k_canv, k_op = jax.random.split(key, 3)

    raw_params = make_raw_params(k_params, N_side, N_ops, N_hidden)
    packed_params = pack_params(raw_params)

    canvs = jax.random.uniform(k_canv, (B, N_side, N_side), jnp.float32)
    op_idxs = jax.random.randint(k_op, (B,), 0, N_ops)

    # Batched kernel call (weights stay VMEM-resident across the batch grid).
    mu, sigma, v = policy_nn_canvas_1_forward_batched(canvs, op_idxs, packed_params, tm=128)
    jax.block_until_ready((mu, sigma, v))

    # f32 reference (vmapped per sample).
    mu_ref, sigma_ref, v_ref = jax.vmap(
        lambda c, o: reference_forward(c, o, raw_params, N_ops))(canvs, op_idxs)
    v_ref = v_ref.reshape(B, 1)

    assert mu.shape == (B, N_side, N_side)
    assert sigma.shape == (B, N_side, N_side)
    assert v.shape == (B, 1)
    # mu/sigma are sigmoid-saturated -> tight tolerance even at default MXU precision;
    # the linear V head gets a slightly looser tolerance (default-precision bf16 MXU
    # passes vs. the f32 reference).
    assert bool(jnp.allclose(mu, mu_ref, atol=2e-3, rtol=2e-3))
    assert bool(jnp.allclose(sigma, sigma_ref, atol=2e-3, rtol=2e-3))
    assert bool(jnp.allclose(v, v_ref, atol=5e-3, rtol=5e-3))

    # Single-sample path (module-equivalent API / output shapes).
    out1 = policy_nn_canvas_1_forward(canvs[0], op_idxs[0], packed_params)
    jax.block_until_ready(out1)
    assert out1['canv_1_mu'].shape == (N_side, N_side)
    assert out1['canv_1_sigma'].shape == (N_side, N_side)
    assert out1['V_canv_1'].shape == (1, 1)
    assert bool(jnp.allclose(out1['canv_1_mu'], mu_ref[0], atol=2e-3, rtol=2e-3))
    assert bool(jnp.allclose(out1['canv_1_sigma'], sigma_ref[0], atol=2e-3, rtol=2e-3))
    assert bool(jnp.allclose(out1['V_canv_1'], v_ref[0:1], atol=5e-3, rtol=5e-3))

    print("KERNEL_OK")
</pallas_src>

<mosaic_0001>
module attributes {stable_mosaic.version = 11 : i64} {
  func.func @_policy_kernel(%arg0: i32, %arg1: memref<128x256xf32, #tpu.memory_space<vmem>>, %arg2: memref<128x64xf32, #tpu.memory_space<vmem>>, %arg3: memref<256x64xf32, #tpu.memory_space<vmem>>, %arg4: memref<1x64xf32, #tpu.memory_space<vmem>>, %arg5: memref<64x640xf32, #tpu.memory_space<vmem>>, %arg6: memref<1x640xf32, #tpu.memory_space<vmem>>, %arg7: memref<128x640xf32, #tpu.memory_space<vmem>>) attributes {dimension_semantics = [#tpu.dimension_semantics<parallel>], iteration_bounds = array<i64: 2>, scalar_prefetch = 0 : i64, scratch_operands = 0 : i64, tpu.core_type = #tpu.core_type<tc>, window_params = [{transform_indices = @transform_0, window_bounds = array<i64: 128, 256>}, {transform_indices = @transform_1, window_bounds = array<i64: 128, 64>}, {pipeline_mode = #tpu.pipeline_mode<synchronous>, transform_indices = @transform_2, window_bounds = array<i64: 256, 64>}, {pipeline_mode = #tpu.pipeline_mode<synchronous>, transform_indices = @transform_3, window_bounds = array<i64: 1, 64>}, {pipeline_mode = #tpu.pipeline_mode<synchronous>, transform_indices = @transform_4, window_bounds = array<i64: 64, 640>}, {pipeline_mode = #tpu.pipeline_mode<synchronous>, transform_indices = @transform_5, window_bounds = array<i64: 1, 640>}, {transform_indices = @transform_6, window_bounds = array<i64: 128, 640>}]} {
    %c0 = arith.constant 0 : index
    %c0_0 = arith.constant 0 : index
    %0 = vector.load %arg1[%c0, %c0_0] : memref<128x256xf32, #tpu.memory_space<vmem>>, vector<128x256xf32>
    %c0_1 = arith.constant 0 : index
    %c0_2 = arith.constant 0 : index
    %1 = vector.load %arg3[%c0_1, %c0_2] : memref<256x64xf32, #tpu.memory_space<vmem>>, vector<256x64xf32>
    %cst = arith.constant dense<0.000000e+00> : vector<128x64xf32>
    %2 = tpu.matmul %0, %1, %cst {dimension_numbers = #tpu.dot_dimension_numbers<[1], [0], [0], [1], [0, 0, 1, 1], [], []>} : vector<128x256xf32>, vector<256x64xf32>, vector<128x64xf32> -> vector<128x64xf32>
    %c0_3 = arith.constant 0 : index
    %c0_4 = arith.constant 0 : index
    %3 = vector.load %arg2[%c0_3, %c0_4] : memref<128x64xf32, #tpu.memory_space<vmem>>, vector<128x64xf32>
    %4 = arith.addf %2, %3 : vector<128x64xf32>
    %c0_5 = arith.constant 0 : index
    %c0_6 = arith.constant 0 : index
    %5 = vector.load %arg4[%c0_5, %c0_6] : memref<1x64xf32, #tpu.memory_space<vmem>>, vector<1x64xf32>
    %6 = vector.broadcast %5 : vector<1x64xf32> to vector<128x64xf32>
    %7 = arith.addf %4, %6 : vector<128x64xf32>
    %cst_7 = arith.constant 0.000000e+00 : f32
    %8 = vector.broadcast %cst_7 : f32 to vector<128x64xf32>
    %9 = arith.maximumf %7, %8 : vector<128x64xf32>
    %c0_8 = arith.constant 0 : index
    %c0_9 = arith.constant 0 : index
    %10 = vector.load %arg5[%c0_8, %c0_9] : memref<64x640xf32, #tpu.memory_space<vmem>>, vector<64x640xf32>
    %cst_10 = arith.constant dense<0.000000e+00> : vector<128x640xf32>
    %11 = tpu.matmul %9, %10, %cst_10 {dimension_numbers = #tpu.dot_dimension_numbers<[1], [0], [0], [1], [0, 0, 1, 1], [], []>} : vector<128x64xf32>, vector<64x640xf32>, vector<128x640xf32> -> vector<128x640xf32>
    %c0_11 = arith.constant 0 : index
    %c0_12 = arith.constant 0 : index
    %12 = vector.load %arg6[%c0_11, %c0_12] : memref<1x640xf32, #tpu.memory_space<vmem>>, vector<1x640xf32>
    %13 = vector.broadcast %12 : vector<1x640xf32> to vector<128x640xf32>
    %14 = arith.addf %11, %13 : vector<128x640xf32>
    %15 = arith.negf %14 : vector<128x640xf32>
    %16 = math.exp %15 : vector<128x640xf32>
    %cst_13 = arith.constant 1.000000e+00 : f32
    %17 = vector.broadcast %cst_13 : f32 to vector<128x640xf32>
    %18 = arith.addf %17, %16 : vector<128x640xf32>
    %19 = arith.divf %17, %18 : vector<128x640xf32>
    %cst_14 = arith.constant 9.800000e-01 : f32
    %20 = vector.broadcast %cst_14 : f32 to vector<128x640xf32>
    %21 = arith.mulf %20, %19 : vector<128x640xf32>
    %cst_15 = arith.constant 0.00999999977 : f32
    %22 = vector.broadcast %cst_15 : f32 to vector<128x640xf32>
    %23 = arith.addf %22, %21 : vector<128x640xf32>
    %24 = tpu.iota {dimensions = array<i32: 1>} : vector<128x640xi32>
    %c256_i32 = arith.constant 256 : i32
    %25 = vector.broadcast %c256_i32 : i32 to vector<128x640xi32>
    %26 = arith.cmpi slt, %24, %25 : vector<128x640xi32>
    %c512_i32 = arith.constant 512 : i32
    %27 = vector.broadcast %c512_i32 : i32 to vector<128x640xi32>
    %28 = arith.cmpi slt, %24, %27 : vector<128x640xi32>
    %29 = arith.select %28, %19, %14 : vector<128x640xi1>, vector<128x640xf32>
    %30 = arith.select %26, %23, %29 : vector<128x640xi1>, vector<128x640xf32>
    %c0_16 = arith.constant 0 : index
    %c0_17 = arith.constant 0 : index
    %31 = vector.load %arg7[%c0_16, %c0_17] : memref<128x640xf32, #tpu.memory_space<vmem>>, vector<128x640xf32>
    tpu.vector_store %arg7[%c0_16, %c0_17], %30 {strides = array<i32>} : memref<128x640xf32, #tpu.memory_space<vmem>>, vector<128x640xf32>,
    return
  }
  func.func @transform_0(%arg0: i32) -> (i32, i32) {
    %c0_i32 = arith.constant 0 : i32
    %c0_i32_0 = arith.constant 0 : i32
    return %arg0, %c0_i32 : i32, i32
  }
  func.func @transform_1(%arg0: i32) -> (i32, i32) {
    %c0_i32 = arith.constant 0 : i32
    %c0_i32_0 = arith.constant 0 : i32
    return %arg0, %c0_i32 : i32, i32
  }
  func.func @transform_2(%arg0: i32) -> (i32, i32) {
    %c0_i32 = arith.constant 0 : i32
    %c0_i32_0 = arith.constant 0 : i32
    %c0_i32_1 = arith.constant 0 : i32
    return %c0_i32, %c0_i32_0 : i32, i32
  }
  func.func @transform_3(%arg0: i32) -> (i32, i32) {
    %c0_i32 = arith.constant 0 : i32
    %c0_i32_0 = arith.constant 0 : i32
    %c0_i32_1 = arith.constant 0 : i32
    return %c0_i32, %c0_i32_0 : i32, i32
  }
  func.func @transform_4(%arg0: i32) -> (i32, i32) {
    %c0_i32 = arith.constant 0 : i32
    %c0_i32_0 = arith.constant 0 : i32
    %c0_i32_1 = arith.constant 0 : i32
    return %c0_i32, %c0_i32_0 : i32, i32
  }
  func.func @transform_5(%arg0: i32) -> (i32, i32) {
    %c0_i32 = arith.constant 0 : i32
    %c0_i32_0 = arith.constant 0 : i32
    %c0_i32_1 = arith.constant 0 : i32
    return %c0_i32, %c0_i32_0 : i32, i32
  }
  func.func @transform_6(%arg0: i32) -> (i32, i32) {
    %c0_i32 = arith.constant 0 : i32
    %c0_i32_0 = arith.constant 0 : i32
    return %arg0, %c0_i32 : i32, i32
  }
}

</mosaic_0001>

<bundles_post_ra>
// kernel: tpu_custom_call.1
= control target key start
LH: loop header
LB: loop body
LE: loop exit
PB: predicated region body
PF: predicated region fallthrough
CT: control target
= control target key end

     0   :  { %11 = vsyncpa [#allocation3], 0  ;;  %s3604_s0 = inlined_call_operand.vmem [shape: f32[256,256], index: 0, kind: input, shape index: {}]   ;;  %s3605_s1 = inlined_call_operand.vmem [shape: f32[256,64], index: 1, kind: input, shape index: {}]   ;;  %s3606_s2 = inlined_call_operand.vmem [shape: f32[256,64], index: 2, kind: input, shape index: {}]   ;;  %s3607_s3 = inlined_call_operand.vmem [shape: f32[1,64], index: 3, kind: input, shape index: {}]   ;;  %s3608_s4 = inlined_call_operand.hbm [shape: f32[64,640], index: 4, kind: input, shape index: {}]   ;;  %s3609_s5 = inlined_call_operand.vmem [shape: f32[1,640], index: 5, kind: input, shape index: {}]   ;;  %s3610_s6 = inlined_call_operand.hbm [shape: f32[256,640], index: 6, kind: output, shape index: {}]  }
   0x1   :  { %12 = vsyncpa [#allocation4], 0 }
   0x2   :  { %14 = vsyncpa [#allocation4 + $0x1], 0  ;;  %s2958_s21 = smov 0   ;;  %s2960_s22 = smov 0  }
   0x3   :  { %s2962_s23 = smov 0   ;;  %s2964_s24 = smov 0  }
   0x4 LB: > { %s2979_s25 = sadd.s32 4294967295, %s2914_s24   ;;  %s2137_s26 = sadd.s32 4294967294, %s2914_s24   ;;  %s2914_s24 = sphi %s2964_s24, %s3626_s24   ;;  %s2910_s23 = sphi %s2962_s23, %s3625_s23   ;;  %s2906_s22 = sphi %s2960_s22, %s3624_s22   ;;  %s2902_s21 = sphi %s2958_s21, %s3623_s21  }
   0x5   : > { %s2983_s27 = sadd.s32 1, %s2914_s24   ;;  %s163_s28 = sadd.s32 1, %s2910_s23 }
   0x6   : > { %s160_s29 = ssub.s32 %s2914_s24, %s2983_s27  ;;  %p173_p0 = scmp.ne.s32.totalorder %s2910_s23, %s2906_s22 }
   0x7   : > { %p161_p1 = scmp.eq.s32.totalorder %s160_s29, 0  ;;  %p174_p2 = scmp.eq.s32.totalorder %s2979_s25, 1 }
   0x8   : > { %p179_p3 = scmp.ne.s32.totalorder %s2906_s22, %s2902_s21  ;;  %p180_p4 = scmp.eq.s32.totalorder %s2137_s26, 1 }
   0x9   : > { %s2994_s30 = scalar_select %p161_p1, %s2910_s23, %s163_s28  }
   0xa   : > { %p2996_p5 = por %p174_p2, %p173_p0  ;;  %p3000_p6 = por %p180_p4, %p179_p3 }
   0xb   : > { %p2138_p7 = scmp.ge.s32.totalorder %s2914_s24, 1  ;;  %p187_p8 = scmp.lt.s32.totalorder %s2914_s24, 3 }
   0xc   : > { %s3614_s7 = scalar_select %p2996_p5, 1, 0 }
   0xd   : > { %s3615_s8 = scalar_select %p3000_p6, 1, 0 }
   0xe   : > { %p3611_p9 = scmp.eq.s32.totalorder %s2979_s25, 0  ;;  %p3007_p10 = pnand %p2138_p7, %p187_p8 }
   0xf   : > { %s2916_s10 = smov [#allocation2]   ;;  %s2820_s15 = scalar_lea.hbm %s3608_s4, 5120 }
  0x10   : > { %s3616_s9 = scalar_select %p3007_p10, 1, 0 }
  0x11   : > { %s205_s11 = sshll.u32 %s2916_s10, 4  ;;  %p2515_p11 = pneg %p3007_p10  ;;  %s206_s11 = int_to_ptr.vmem [resolvable:$true] %s205_s11 }
  0x12   : > { %p2821_p13 = scmp.ne.s32.totalorder %s3608_s4, %s2820_s15  ;;  %p2827_p3 = scmp.lt.u32.totalorder %s2820_s15, %s3608_s4 }
  0x13   : > { %p3015_p12 = pnand %p3611_p9, %p2515_p11 }
  0x15   : > { %p2822_p0 = pneg %p3015_p12 }
  0x17   : > { %p2823_p1 = pnand %p2822_p0, %p2821_p13 }
  0x19   : > { %p2824_p2 = pneg %p2823_p1 }
  0x1b   : > { %p2829_p4 = pnand %p2827_p3, %p2824_p2 }
  0x1d   : > { %2832 = shalt.err (!%p2829_p4)
}
  0x1e   : > { %s2833_s20 = scalar_lea.vmem %s206_s11, 5120  ;;  %p2841_p9 = scmp.lt.s32.totalorder %s206_s11, %s206_s11 }
  0x1f   : > { %p2834_p7 = scmp.ne.s32.totalorder %s206_s11, %s2833_s20  ;;  %p2842_p6 = scmp.lt.s32.totalorder %s2833_s20, %s2833_s20 }
  0x21   : > { %p2836_p8 = pnand %p2834_p7, %p2822_p0  ;;  %p2843_p5 = por %p2842_p6, %p2841_p9 }
  0x23   : > { %p2837_p11 = pneg %p2836_p8 }
  0x25   : > { %p2844_p10 = pnand %p2843_p5, %p2837_p11 }
  0x27   : > { %2847 = shalt.err (!%p2844_p10)
}
  0x28   : > { %s2917_s26 = smov 640   ;;  %s2918_s28 = smov 40  }
  0x29   : > { %2518 = dma.hbm_to_vmem [thread:$0]  (!%p3015_p12), %s3608_s4, 5120, %s206_s11, [#allocation3], %s2917_s26, %s2917_s26, %s2918_s28  }
  0x2a   : > { %p3618_p13 = scmp.ne.s32.totalorder %s3616_s9, 0 }
  0x2b   : > { %p3619_p1 = scmp.eq.s32.totalorder (!%p3618_p13), %s2979_s25, 0 }
  0x2c   : > { %243 = sbr.rel (%p3618_p13) target bundleno = 692 (0x2b4), region = 44 }
  0x33   : > { %2893 = dma.done.wait (%p3619_p1), [#allocation3], 5120   ;;  %p3620_p0 = pmov %p3619_p1 }
  0x34   : > { %s2143_s13 = sshll.u32 %s2979_s25, 4  ;;  %v341_v0 = vld [vmem:[%s3606_s2 + $0x80] sm:$0xff]  ;;  %v342_v1 = vld [vmem:[%s3606_s2 + $0x88] sm:$0xff]  ;;  %v343_v5 = vld [vmem:[%s3606_s2 + $0x90] sm:$0xff]  ;;  %vm624_vm0 = vcmask 523264   ;;  %s276_s19 = sand.u32 1, %s2906_s22  }
  0x35   : > { %2895 = vsyncadd (%p3620_p0), [#allocation3], 4294962176  ;;  %p280_p5 = scmp.lt.s32.totalorder %s2143_s13, 31  ;;  %v325_v2 = vld [vmem:[%s3606_s2] sm:$0xff]  ;;  %v2427_v3 = vpack.c.bf16 %v342_v1, %v341_v0  ;;  %v326_v4 = vld [vmem:[%s3606_s2 + $0x8] sm:$0xff]  ;;  %s2507_s20 = smul.u32 640, %s276_s19 }
  0x36   : > { %v344_v6 = vld [vmem:[%s3606_s2 + $0x98] sm:$0xff]  ;;  %v2429_v7 = vpack.c.bf16 %v326_v4, %v325_v2  ;;  %v327_v9 = vld [vmem:[%s3606_s2 + $0x10] sm:$0xff]  ;;  %v345_v11 = vld [vmem:[%s3606_s2 + $0xa0] sm:$0xff]  ;;  %s2508_s28 = smul.u32 10240, %s2979_s25  ;;  %s3563_s25 = scalar_lea.sflag [#allocation4], %s276_s19 }
  0x37   : > { %s3628_s13 = smov (!%p280_p5, %s2143_s13), 31  ;;  %v2431_v8 = vpack.c.bf16 %v344_v6, %v343_v5  ;;  %v328_v10 = vld [vmem:[%s3606_s2 + $0x18] sm:$0xff]  ;;  %2428 = vmatprep.subr.bf16.mxu0 %v2427_v3  ;;  %v346_v12 = vld [vmem:[%s3606_s2 + $0xa8] sm:$0xff]  ;;  %v329_v15 = vld [vmem:[%s3606_s2 + $0x20] sm:$0xff]  ;;  %s3384_s26 = scalar_lea.vmem [#allocation5], %s2507_s20 }
  0x38   : > { %2430 = vmatpush3.bf16.msra.mxu0 %v2429_v7  ;;  %v2433_v13 = vpack.c.bf16 %v328_v10, %v327_v9  ;;  %s2282_s17 = sshll.u32 %s3628_s13, 4  ;;  %v2435_v14 = vpack.c.bf16 %v346_v12, %v345_v11  ;;  %v330_v16 = vld [vmem:[%s3606_s2 + $0x28] sm:$0xff]  ;;  %v347_v17 = vld [vmem:[%s3606_s2 + $0xb0] sm:$0xff]  ;;  %v348_v18 = vld [vmem:[%s3606_s2 + $0xb8] sm:$0xff]  ;;  %p3621_p9 = scmp.ne.s32.totalorder %s3614_s7, 0 }
  0x39   : > { %2432 = vmatprep.subr.bf16.mxu0 %v2431_v8  ;;  %s3090_s16 = scalar_lea.vmem %s3604_s0, %s2282_s17  ;;  %v2437_v19 = vpack.c.bf16 %v330_v16, %v329_v15  ;;  %v2439_v20 = vpack.c.bf16 %v348_v18, %v347_v17  ;;  %v331_v21 = vld [vmem:[%s3606_s2 + $0x30] sm:$0xff]  ;;  %v332_v22 = vld [vmem:[%s3606_s2 + $0x38] sm:$0xff]  ;;  %v349_v23 = vld [vmem:[%s3606_s2 + $0xc0] sm:$0xff]  ;;  %s2051_s17 = sshll.u32 %s3384_s26, 4  ;;  %s3557_s17 = int_to_ptr.vmem [resolvable:$true] %s2051_s17 }
  0x3a   : > { %v350_v24 = vld [vmem:[%s3606_s2 + $0xc8] sm:$0xff]  ;;  %v2441_v26 = vpack.c.bf16 %v332_v22, %v331_v21  ;;  %v333_v28 = vld [vmem:[%s3606_s2 + $0x40] sm:$0xff]  ;;  %v351_v30 = vld [vmem:[%s3606_s2 + $0xd0] sm:$0xff]  ;;  %s2848_s14 = scalar_lea.vmem %s3557_s17, 10240  ;;  %s2920_s15 = smov [#allocation5]  }
  0x3b   : > { %v294_v25 = vld [vmem:[%s3090_s16 + $0x8] sm:$0xff]  ;;  %v2443_v27 = vpack.c.bf16 %v350_v24, %v349_v23  ;;  %v352_v31 = vld [vmem:[%s3606_s2 + $0xd8] sm:$0xff]  ;;  %v335_v34 = vld [vmem:[%s3606_s2 + $0x50] sm:$0xff]  ;;  %p2849_p6 = scmp.ne.s32.totalorder %s3557_s17, %s2848_s14 }
  0x3c   : > { %2434 = vmatpush3.bf16.msra.mxu0 %v2433_v13  ;;  %437 = vmatprep.mubr.f32.mxu0 %v294_v25  ;;  %v334_v29 = vld [vmem:[%s3606_s2 + $0x48] sm:$0xff]  ;;  %v2447_v33 = vpack.c.bf16 %v352_v31, %v351_v30  ;;  %v336_v35 = vld [vmem:[%s3606_s2 + $0x58] sm:$0xff]  ;;  %v353_v36 = vld [vmem:[%s3606_s2 + $0xe0] sm:$0xff] }
  0x3d   : > { %2436 = vmatprep.subr.bf16.mxu0 %v2435_v14  ;;  %v2445_v32 = vpack.c.bf16 %v334_v29, %v333_v28  ;;  %v354_v37 = vld [vmem:[%s3606_s2 + $0xe8] sm:$0xff]  ;;  %v2449_v38 = vpack.c.bf16 %v336_v35, %v335_v34  ;;  %v337_v39 = vld [vmem:[%s3606_s2 + $0x60] sm:$0xff]  ;;  %v355_v41 = vld [vmem:[%s3606_s2 + $0xf0] sm:$0xff]  ;;  %p2850_p10 = pnand %p2849_p6, %p3621_p9 }
  0x3e   : > { %v338_v40 = vld [vmem:[%s3606_s2 + $0x68] sm:$0xff]  ;;  %v2451_v42 = vpack.c.bf16 %v354_v37, %v353_v36  ;;  %v356_v43 = vld [vmem:[%s3606_s2 + $0xf8] sm:$0xff]  ;;  %v563_v45 = vld [vmem:[#allocation2 + $0x30] sm:$0xff] }
  0x3f   : > { %v558_v44 = vld [vmem:[#allocation2 + $0x8] sm:$0xff]  ;;  %v557_v47 = vld [vmem:[#allocation2] sm:$0xff]  ;;  %v568_v49 = vld [vmem:[#allocation2 + $0x58] sm:$0xff]  ;;  %v2453_v54 = vpack.c.bf16 %v338_v40, %v337_v39  ;;  %v2455_v56 = vpack.c.bf16 %v356_v43, %v355_v41  ;;  %p2851_p12 = pneg %p2850_p10 }
  0x40   : > { %2438 = vmatpush3.bf16.msra.mxu0 %v2437_v19  ;;  %v2459_v46 = vpack.c.bf16 %v563_v45, %v558_v44  ;;  %v562_v48 = vld [vmem:[#allocation2 + $0x28] sm:$0xff]  ;;  %v573_v51 = vld [vmem:[#allocation2 + $0x80] sm:$0xff]  ;;  %v567_v52 = vld [vmem:[#allocation2 + $0x50] sm:$0xff] }
  0x41   : > { %2440 = vmatprep.subr.bf16.mxu0 %v2439_v20  ;;  %v2461_v50 = vpack.c.bf16 %v562_v48, %v557_v47  ;;  %v572_v53 = vld [vmem:[#allocation2 + $0x78] sm:$0xff]  ;;  %v2463_v55 = vpack.c.bf16 %v573_v51, %v568_v49  ;;  %v339_v57 = vld [vmem:[%s3606_s2 + $0x70] sm:$0xff]  ;;  %v561_v60 = vld [vmem:[#allocation2 + $0x20] sm:$0xff] }
  0x42   : > { %2460 = vmatprep.subr.bf16.mxu1 %v2459_v46  ;;  %v340_v58 = vld [vmem:[%s3606_s2 + $0x78] sm:$0xff]  ;;  %v2465_v59 = vpack.c.bf16 %v572_v53, %v567_v52  ;;  %v566_v61 = vld [vmem:[#allocation2 + $0x48] sm:$0xff]  ;;  %v293_v0 = vld [vmem:[%s3090_s16] sm:$0xff]  ;;  %v2919_v52 = vmov 0.0  }
  0x43   : > { %2462 = vmatpush1.bf16.msra.mxu1 %v2461_v50  ;;  %v2457_v62 = vpack.c.bf16 %v340_v58, %v339_v57  ;;  %v2491_v63 = vpack.c.bf16 %v566_v61, %v561_v60  ;;  %v296_v1 = vld [vmem:[%s3090_s16 + $0x18] sm:$0xff]  ;;  %v295_v2 = vld [vmem:[%s3090_s16 + $0x10] sm:$0xff]  ;;  %v298_v3 = vld [vmem:[%s3090_s16 + $0x28] sm:$0xff]  ;;  %737 = vmatprep.mubr.f32.mxu1 %v2919_v52 }
  0x44   : > { %2442 = vmatpush3.bf16.msra.mxu0 %v2441_v26  ;;  %2464 = vmatprep.subr.bf16.mxu1 %v2463_v55  ;;  %v297_v4 = vld [vmem:[%s3090_s16 + $0x20] sm:$0xff]  ;;  %v300_v5 = vld [vmem:[%s3090_s16 + $0x38] sm:$0xff]  ;;  %v299_v6 = vld [vmem:[%s3090_s16 + $0x30] sm:$0xff] }
  0x45   : > { %2444 = vmatprep.subr.bf16.mxu0 %v2443_v27  ;;  %v302_v7 = vld [vmem:[%s3090_s16 + $0x48] sm:$0xff]  ;;  %v301_v8 = vld [vmem:[%s3090_s16 + $0x40] sm:$0xff]  ;;  %v304_v9 = vld [vmem:[%s3090_s16 + $0x58] sm:$0xff] }
  0x46   : > { %v303_v10 = vld [vmem:[%s3090_s16 + $0x50] sm:$0xff]  ;;  %v306_v11 = vld [vmem:[%s3090_s16 + $0x68] sm:$0xff]  ;;  %v305_v12 = vld [vmem:[%s3090_s16 + $0x60] sm:$0xff] }
  0x47   : > { %2466 = vmatpush1.bf16.msra.mxu1 %v2465_v59  ;;  %v308_v13 = vld [vmem:[%s3090_s16 + $0x78] sm:$0xff]  ;;  %v307_v14 = vld [vmem:[%s3090_s16 + $0x70] sm:$0xff]  ;;  %v310_v15 = vld [vmem:[%s3090_s16 + $0x88] sm:$0xff] }
  0x48   : > { %2446 = vmatpush3.bf16.msra.mxu0 %v2445_v32  ;;  %v309_v16 = vld [vmem:[%s3090_s16 + $0x80] sm:$0xff]  ;;  %v312_v17 = vld [vmem:[%s3090_s16 + $0x98] sm:$0xff]  ;;  %v311_v18 = vld [vmem:[%s3090_s16 + $0x90] sm:$0xff] }
  0x49   : > { %2448 = vmatprep.subr.bf16.mxu0 %v2447_v33  ;;  %v314_v19 = vld [vmem:[%s3090_s16 + $0xa8] sm:$0xff]  ;;  %v313_v20 = vld [vmem:[%s3090_s16 + $0xa0] sm:$0xff]  ;;  %v316_v21 = vld [vmem:[%s3090_s16 + $0xb8] sm:$0xff] }
  0x4a   : > { %v315_v22 = vld [vmem:[%s3090_s16 + $0xb0] sm:$0xff]  ;;  %v318_v23 = vld [vmem:[%s3090_s16 + $0xc8] sm:$0xff]  ;;  %v317_v24 = vld [vmem:[%s3090_s16 + $0xc0] sm:$0xff] }
  0x4b   : > { %v320_v25 = vld [vmem:[%s3090_s16 + $0xd8] sm:$0xff]  ;;  %v319_v26 = vld [vmem:[%s3090_s16 + $0xd0] sm:$0xff]  ;;  %v322_v27 = vld [vmem:[%s3090_s16 + $0xe8] sm:$0xff] }
  0x4c   : > { %2450 = vmatpush3.bf16.msra.mxu0 %v2449_v38  ;;  %v321_v28 = vld [vmem:[%s3090_s16 + $0xe0] sm:$0xff]  ;;  %v324_v29 = vld [vmem:[%s3090_s16 + $0xf8] sm:$0xff]  ;;  %v323_v30 = vld [vmem:[%s3090_s16 + $0xf0] sm:$0xff]  ;;  %s2147_s16 = sshll.u32 %s3628_s13, 3 }
  0x4d   : > { %2452 = vmatprep.subr.bf16.mxu0 %v2451_v42  ;;  %v578_v31 = vld [vmem:[#allocation2 + $0xa8] sm:$0xff]  ;;  %v583_v32 = vld [vmem:[#allocation2 + $0xd0] sm:$0xff]  ;;  %v577_v35 = vld [vmem:[#allocation2 + $0xa0] sm:$0xff]  ;;  %s3183_s12 = scalar_lea.vmem %s3605_s1, %s2147_s16  ;;  %s3555_s16 = scalar_lea.hbm %s3610_s6, %s2508_s28 }
  0x4e   : > { %v571_v33 = vld [vmem:[#allocation2 + $0x70] sm:$0xff]  ;;  %v2467_v34 = vpack.c.bf16 %v583_v32, %v578_v31  ;;  %v582_v36 = vld [vmem:[#allocation2 + $0xc8] sm:$0xff]  ;;  %v576_v37 = vld [vmem:[#allocation2 + $0x98] sm:$0xff] }
  0x4f   : > { %v2469_v38 = vpack.c.bf16 %v582_v36, %v577_v35  ;;  %v2495_v39 = vpack.c.bf16 %v576_v37, %v571_v33  ;;  %v588_v40 = vld [vmem:[#allocation2 + $0xf8] sm:$0xff]  ;;  %v593_v41 = vld [vmem:[#allocation2 + $0x120] sm:$0xff]  ;;  %v587_v44 = vld [vmem:[#allocation2 + $0xf0] sm:$0xff] }
  0x50   : > { %2454 = vmatpush3.bf16.msra.mxu0 %v2453_v54  ;;  %2468 = vmatprep.subr.bf16.mxu1 %v2467_v34  ;;  %v581_v42 = vld [vmem:[#allocation2 + $0xc0] sm:$0xff]  ;;  %v2471_v43 = vpack.c.bf16 %v593_v41, %v588_v40  ;;  %v592_v45 = vld [vmem:[#allocation2 + $0x118] sm:$0xff]  ;;  %v586_v47 = vld [vmem:[#allocation2 + $0xe8] sm:$0xff] }
  0x51   : > { %2456 = vmatprep.subr.bf16.mxu0 %v2455_v56  ;;  %2470 = vmatpush1.bf16.msra.mxu1 %v2469_v38  ;;  %v2473_v46 = vpack.c.bf16 %v592_v45, %v587_v44  ;;  %v2499_v48 = vpack.c.bf16 %v586_v47, %v581_v42  ;;  %v591_v49 = vld [vmem:[#allocation2 + $0x110] sm:$0xff]  ;;  %v596_v50 = vld [vmem:[#allocation2 + $0x138] sm:$0xff]  ;;  %v565_v54 = vld [vmem:[#allocation2 + $0x40] sm:$0xff] }
  0x52   : > { %2472 = vmatprep.subr.bf16.mxu1 %v2471_v43  ;;  %v2503_v51 = vpack.c.bf16 %v596_v50, %v591_v49  ;;  %v560_v53 = vld [vmem:[#allocation2 + $0x18] sm:$0xff]  ;;  %v357_v57 = vld [vmem:[%s3183_s12] sm:$0xff] }
  0x53   : > { %v2475_v55 = vpack.c.bf16 %v565_v54, %v560_v53  ;;  %v3189_v60 = vld [vmem:[%s3607_s3] ss:$0 sm:$0xff] }
  0x54   : > { %2458 = vmatpush3.bf16.msra.mxu0 %v2457_v62  ;;  %v589_v38 = vld [vmem:[#allocation2 + $0x100] sm:$0xff] }
  0x55   : > { %2492 = vmatprep.subr.bf16.mxu0 %v2491_v63  ;;  %2474 = vmatpush1.bf16.msra.mxu1 %v2473_v46  ;;  %v361_v40 = vld [vmem:[%s3183_s12 + $0x20] sm:$0xff] }
  0x56   : > { %2476 = vmatprep.subr.bf16.mxu1 %v2475_v55 }
  0x57   : > { %438 = vmatmul.mubr.f32.vlgmr.msra.gmra.mrb[0].mxu0 %v293_v0  ;;  %v564_v0 = vld [vmem:[#allocation2 + $0x38] sm:$0xff] }
  0x58   : > { %442 = vmatprep.mubr.f32.mxu0 %v296_v1  ;;  %2494 = vmatpush3.bf16.msra.mxu0 %v2491_v63  ;;  %v559_v63 = vld [vmem:[#allocation2 + $0x10] sm:$0xff]  ;;  %v358_v1 = vld [vmem:[%s3183_s12 + $0x8] sm:$0xff] }
  0x59   : > { %2496 = vmatprep.subr.bf16.mxu0 %v2495_v39 }
  0x5b   : > { %443 = vmatmul.mubr.f32.gmra.mrb[2].mxu0 %v295_v2 }
  0x5c   : > { %447 = vmatprep.mubr.f32.mxu0 %v298_v3  ;;  %2498 = vmatpush3.bf16.msra.mxu0 %v2495_v39  ;;  %v570_v3 = vld [vmem:[#allocation2 + $0x68] sm:$0xff] }
  0x5d   : > { %2500 = vmatprep.subr.bf16.mxu0 %v2499_v48  ;;  %v594_v39 = vld [vmem:[#allocation2 + $0x128] sm:$0xff] }
  0x5e   : > { %v2489_v44 = vpack.c.bf16 %v594_v39, %v589_v38  ;;  %v369_v38 = vld [vmem:[%s3183_s12 + $0x60] sm:$0xff] }
  0x5f   : > { %448 = vmatmul.mubr.f32.gmra.mrb[4].mxu0 %v297_v4  ;;  %v575_v4 = vld [vmem:[#allocation2 + $0x90] sm:$0xff] }
  0x60   : > { %452 = vmatprep.mubr.f32.mxu0 %v300_v5  ;;  %2502 = vmatpush3.bf16.msra.mxu0 %v2499_v48  ;;  %v362_v48 = vld [vmem:[%s3183_s12 + $0x28] sm:$0xff] }
  0x61   : > { %2504 = vmatprep.subr.bf16.mxu0 %v2503_v51 }
  0x63   : > { %453 = vmatmul.mubr.f32.gmra.mrb[6].mxu0 %v299_v6 }
  0x64   : > { %457 = vmatprep.mubr.f32.mxu0 %v302_v7  ;;  %2506 = vmatpush3.bf16.msra.mxu0 %v2503_v51  ;;  %v2477_v7 = vpack.c.bf16 %v564_v0, %v559_v63  ;;  %v364_v0 = vld [vmem:[%s3183_s12 + $0x38] sm:$0xff] }
  0x67   : > { %458 = vmatmul.mubr.f32.gmra.mrb[8].mxu0 %v301_v8 }
  0x68   : > { %462 = vmatprep.mubr.f32.mxu0 %v304_v9 }
  0x6b   : > { %463 = vmatmul.mubr.f32.gmra.mrb[10].mxu0 %v303_v10 }
  0x6c   : > { %467 = vmatprep.mubr.f32.mxu0 %v306_v11  ;;  %v2479_v11 = vpack.c.bf16 %v575_v4, %v570_v3 }
  0x6f   : > { %468 = vmatmul.mubr.f32.gmra.mrb[12].mxu0 %v305_v12  ;;  %v569_v12 = vld [vmem:[#allocation2 + $0x60] sm:$0xff] }
  0x70   : > { %472 = vmatprep.mubr.f32.mxu0 %v308_v13  ;;  %v574_v13 = vld [vmem:[#allocation2 + $0x88] sm:$0xff] }
  0x73   : > { %473 = vmatmul.mubr.f32.gmra.mrb[14].mxu0 %v307_v14  ;;  %v359_v14 = vld [vmem:[%s3183_s12 + $0x10] sm:$0xff] }
  0x74   : > { %477 = vmatprep.mubr.f32.mxu0 %v310_v15 }
  0x77   : > { %478 = vmatmul.mubr.f32.gmra.mrb[16].mxu0 %v309_v16  ;;  %v580_v16 = vld [vmem:[#allocation2 + $0xb8] sm:$0xff] }
  0x78   : > { %482 = vmatprep.mubr.f32.mxu0 %v312_v17  ;;  %v585_v17 = vld [vmem:[#allocation2 + $0xe0] sm:$0xff] }
  0x7b   : > { %483 = vmatmul.mubr.f32.gmra.mrb[18].mxu0 %v311_v18 }
  0x7c   : > { %487 = vmatprep.mubr.f32.mxu0 %v314_v19 }
  0x7f   : > { %488 = vmatmul.mubr.f32.gmra.mrb[20].mxu0 %v313_v20  ;;  %v2481_v20 = vpack.c.bf16 %v574_v13, %v569_v12 }
  0x80   : > { %492 = vmatprep.mubr.f32.mxu0 %v316_v21 }
  0x83   : > { %493 = vmatmul.mubr.f32.gmra.mrb[22].mxu0 %v315_v22 }
  0x84   : > { %497 = vmatprep.mubr.f32.mxu0 %v318_v23 }
  0x87   : > { %498 = vmatmul.mubr.f32.gmra.mrb[24].mxu0 %v317_v24  ;;  %v2483_v24 = vpack.c.bf16 %v585_v17, %v580_v16 }
  0x88   : > { %502 = vmatprep.mubr.f32.mxu0 %v320_v25  ;;  %v579_v25 = vld [vmem:[#allocation2 + $0xb0] sm:$0xff] }
  0x8b   : > { %503 = vmatmul.mubr.f32.gmra.mrb[26].mxu0 %v319_v26  ;;  %v584_v26 = vld [vmem:[#allocation2 + $0xd8] sm:$0xff] }
  0x8c   : > { %507 = vmatprep.mubr.f32.mxu0 %v322_v27  ;;  %v360_v27 = vld [vmem:[%s3183_s12 + $0x18] sm:$0xff]  ;;  %v2485_v33 = vpack.c.bf16 %v584_v26, %v579_v25 }
  0x8f   : > { %508 = vmatmul.mubr.f32.gmra.mrb[28].mxu0 %v321_v28 }
  0x90   : > { %512 = vmatprep.mubr.f32.mxu0 %v324_v29  ;;  %v590_v29 = vld [vmem:[#allocation2 + $0x108] sm:$0xff] }
  0x93   : > { %513 = vmatmul.mubr.f32.gmra.mrb[30].mxu0 %v323_v30  ;;  %v595_v30 = vld [vmem:[#allocation2 + $0x130] sm:$0xff] }
  0x94   : > { %v2487_v37 = vpack.c.bf16 %v595_v30, %v590_v29  ;;  %v368_v30 = vld [vmem:[%s3183_s12 + $0x58] sm:$0xff] }
 0x12a   : > { %v2315_v56 = vpop.f32.mrb[0].mxu0 }
 0x12b   : > { %v2316_v58 = vpop.f32.mrb[1].mxu0 }
 0x12c   : > { %v2317_v59 = vadd.f32 %v2316_v58, %v2315_v56  ;;  %v363_v56 = vld [vmem:[%s3183_s12 + $0x30] sm:$0xff] }
 0x12e   : > { %v440_v61 = vadd.f32 %v2317_v59, %v357_v57  ;;  %v2318_v62 = vpop.f32.mrb[2].mxu0 }
 0x12f   : > { %v2319_v2 = vpop.f32.mrb[3].mxu0 }
 0x130   : > { %v525_v5 = vadd.f32 %v3189_v60, %v440_v61  ;;  %v2320_v6 = vadd.f32 %v2319_v2, %v2318_v62 }
 0x132   : > { %v3193_v8 = vmax.f32 %v525_v5, 0.0  ;;  %v445_v9 = vadd.f32 %v2320_v6, %v358_v1  ;;  %v2321_v10 = vpop.f32.mrb[4].mxu0 }
 0x133   : > { %v2322_v15 = vpop.f32.mrb[5].mxu0 }
 0x134   : > { %v526_v18 = vadd.f32 %v3189_v60, %v445_v9  ;;  %v2323_v19 = vadd.f32 %v2322_v15, %v2321_v10  ;;  %2149 = vmatmul.mubr.msk.f32.vlgmr.msra.gmra.mrb[0].mxu1 %vm624_vm0, %v3193_v8  ;;  %2403 = vmatprep.mubr.msk.f32.mxu0 %vm624_vm0, %v3193_v8  ;;  %v366_v15 = vld [vmem:[%s3183_s12 + $0x48] sm:$0xff] }
 0x135   : > { %2478 = vmatpush1.bf16.msra.mxu1 %v2477_v7  ;;  %743 = vmatprep.mubr.f32.mxu1 %v2919_v52  ;;  %v365_v7 = vld [vmem:[%s3183_s12 + $0x40] sm:$0xff] }
 0x136   : > { %v3202_v21 = vmax.f32 %v526_v18, 0.0  ;;  %v450_v22 = vadd.f32 %v2323_v19, %v359_v14  ;;  %v2324_v23 = vpop.f32.mrb[6].mxu0  ;;  %2480 = vmatprep.subr.bf16.mxu1 %v2479_v11 }
 0x137   : > { %v2325_v28 = vpop.f32.mrb[7].mxu0 }
 0x138   : > { %v527_v31 = vadd.f32 %v3189_v60, %v450_v22  ;;  %v2326_v32 = vadd.f32 %v2325_v28, %v2324_v23  ;;  %2150 = vmatmul.mubr.msk.f32.gmra.mrb[2].mxu1 %vm624_vm0, %v3202_v21  ;;  %2404 = vmatmul.mubr.msk.f32.vlgmr.msra.gmra.mrb[32].mxu0 %vm624_vm0, %v3202_v21  ;;  %v367_v23 = vld [vmem:[%s3183_s12 + $0x50] sm:$0xff] }
 0x139   : > { %749 = vmatprep.mubr.f32.mxu1 %v2919_v52  ;;  %2482 = vmatpush1.bf16.msra.mxu1 %v2481_v20 }
 0x13a   : > { %v3211_v34 = vmax.f32 %v527_v31, 0.0  ;;  %v455_v35 = vadd.f32 %v2326_v32, %v360_v27  ;;  %v2327_v36 = vpop.f32.mrb[8].mxu0  ;;  %2484 = vmatprep.subr.bf16.mxu1 %v2483_v24 }
 0x13b   : > { %v2328_v41 = vpop.f32.mrb[9].mxu0 }
 0x13c   : > { %v528_v42 = vadd.f32 %v3189_v60, %v455_v35  ;;  %v2329_v43 = vadd.f32 %v2328_v41, %v2327_v36  ;;  %2151 = vmatmul.mubr.msk.f32.gmra.mrb[4].mxu1 %vm624_vm0, %v3211_v34  ;;  %2406 = vmatprep.mubr.msk.f32.mxu0 %vm624_vm0, %v3211_v34 }
 0x13d   : > { %755 = vmatprep.mubr.f32.mxu1 %v2919_v52  ;;  %2486 = vmatpush1.bf16.msra.mxu1 %v2485_v33 }
 0x13e   : > { %v3220_v45 = vmax.f32 %v528_v42, 0.0  ;;  %v460_v46 = vadd.f32 %v2329_v43, %v361_v40  ;;  %v2330_v47 = vpop.f32.mrb[10].mxu0  ;;  %2488 = vmatprep.subr.bf16.mxu1 %v2487_v37 }
 0x13f   : > { %v2331_v49 = vpop.f32.mrb[11].mxu0 }
 0x140   : > { %v529_v50 = vadd.f32 %v3189_v60, %v460_v46  ;;  %v2332_v51 = vadd.f32 %v2331_v49, %v2330_v47  ;;  %2152 = vmatmul.mubr.msk.f32.gmra.mrb[6].mxu1 %vm624_vm0, %v3220_v45  ;;  %2407 = vmatmul.mubr.msk.f32.gmra.mrb[34].mxu0 %vm624_vm0, %v3220_v45  ;;  %v370_v46 = vld [vmem:[%s3183_s12 + $0x68] sm:$0xff] }
 0x141   : > { %761 = vmatprep.mubr.f32.mxu1 %v2919_v52  ;;  %2490 = vmatpush1.bf16.msra.mxu1 %v2489_v44 }
 0x142   : > { %v3229_v53 = vmax.f32 %v529_v50, 0.0  ;;  %v465_v54 = vadd.f32 %v2332_v51, %v362_v48  ;;  %v2333_v55 = vpop.f32.mrb[12].mxu0 }
 0x143   : > { %v2334_v57 = vpop.f32.mrb[13].mxu0 }
 0x144   : > { %v530_v58 = vadd.f32 %v3189_v60, %v465_v54  ;;  %v2335_v59 = vadd.f32 %v2334_v57, %v2333_v55  ;;  %2153 = vmatmul.mubr.msk.f32.gmra.mrb[8].mxu1 %vm624_vm0, %v3229_v53  ;;  %2409 = vmatprep.mubr.msk.f32.mxu0 %vm624_vm0, %v3229_v53  ;;  %v371_v55 = vld [vmem:[%s3183_s12 + $0x70] sm:$0xff] }
 0x145   : > { %767 = vmatprep.mubr.f32.mxu1 %v2919_v52 }
 0x146   : > { %v3238_v61 = vmax.f32 %v530_v58, 0.0  ;;  %v470_v62 = vadd.f32 %v2335_v59, %v363_v56  ;;  %v2336_v63 = vpop.f32.mrb[14].mxu0 }
 0x147   : > { %v2337_v1 = vpop.f32.mrb[15].mxu0 }
 0x148   : > { %v531_v2 = vadd.f32 %v3189_v60, %v470_v62  ;;  %v2338_v3 = vadd.f32 %v2337_v1, %v2336_v63  ;;  %2154 = vmatmul.mubr.msk.f32.gmra.mrb[10].mxu1 %vm624_vm0, %v3238_v61  ;;  %2410 = vmatmul.mubr.msk.f32.gmra.mrb[36].mxu0 %vm624_vm0, %v3238_v61 }
 0x149   : > { %773 = vmatprep.mubr.f32.mxu1 %v2919_v52 }
 0x14a   : > { %v3247_v4 = vmax.f32 %v531_v2, 0.0  ;;  %v475_v5 = vadd.f32 %v2338_v3, %v364_v0  ;;  %v2339_v6 = vpop.f32.mrb[16].mxu0  ;;  %v372_v0 = vld [vmem:[%s3183_s12 + $0x78] sm:$0xff]  ;;  %s2852_s12 = sshll.u32 %s2920_s15, 4  ;;  %s2853_s12 = int_to_ptr.vmem [resolvable:$false] %s2852_s12 }
 0x14b   : > { %v2340_v9 = vpop.f32.mrb[17].mxu0  ;;  %s2854_s11 = scalar_lea.vmem %s2853_s12, 20480  ;;  %p2855_p2 = scmp.lt.s32.totalorder %s3557_s17, %s2853_s12 }
 0x14c   : > { %v532_v10 = vadd.f32 %v3189_v60, %v475_v5  ;;  %v2341_v11 = vadd.f32 %v2340_v9, %v2339_v6  ;;  %2155 = vmatmul.mubr.msk.f32.gmra.mrb[12].mxu1 %vm624_vm0, %v3247_v4  ;;  %2412 = vmatprep.mubr.msk.f32.mxu0 %vm624_vm0, %v3247_v4  ;;  %p2856_p3 = scmp.lt.s32.totalorder %s2854_s11, %s2848_s14 }
 0x14d   : > { %779 = vmatprep.mubr.f32.mxu1 %v2919_v52 }
 0x14e   : > { %v3256_v12 = vmax.f32 %v532_v10, 0.0  ;;  %v480_v13 = vadd.f32 %v2341_v11, %v365_v7  ;;  %v2342_v14 = vpop.f32.mrb[18].mxu0  ;;  %p2857_p4 = por %p2856_p3, %p2855_p2 }
 0x14f   : > { %v2343_v16 = vpop.f32.mrb[19].mxu0 }
 0x150   : > { %v533_v17 = vadd.f32 %v3189_v60, %v480_v13  ;;  %v2344_v18 = vadd.f32 %v2343_v16, %v2342_v14  ;;  %2156 = vmatmul.mubr.msk.f32.gmra.mrb[14].mxu1 %vm624_vm0, %v3256_v12  ;;  %2413 = vmatmul.mubr.msk.f32.gmra.mrb[38].mxu0 %vm624_vm0, %v3256_v12  ;;  %p2858_p7 = pnand %p2857_p4, %p2851_p12 }
 0x151   : > { %785 = vmatprep.mubr.f32.mxu1 %v2919_v52 }
 0x152   : > { %v3265_v19 = vmax.f32 %v533_v17, 0.0  ;;  %v485_v20 = vadd.f32 %v2344_v18, %v366_v15  ;;  %v2345_v22 = vpop.f32.mrb[20].mxu0 }
 0x153   : > { %v2346_v24 = vpop.f32.mrb[21].mxu0 }
 0x154   : > { %v534_v25 = vadd.f32 %v3189_v60, %v485_v20  ;;  %v2347_v26 = vadd.f32 %v2346_v24, %v2345_v22  ;;  %2157 = vmatmul.mubr.msk.f32.gmra.mrb[16].mxu1 %vm624_vm0, %v3265_v19  ;;  %2415 = vmatprep.mubr.msk.f32.mxu0 %vm624_vm0, %v3265_v19 }
 0x155   : > { %791 = vmatprep.mubr.f32.mxu1 %v2919_v52 }
 0x156   : > { %v3274_v27 = vmax.f32 %v534_v25, 0.0  ;;  %v490_v28 = vadd.f32 %v2347_v26, %v367_v23  ;;  %v2348_v29 = vpop.f32.mrb[22].mxu0 }
 0x157   : > { %v2349_v31 = vpop.f32.mrb[23].mxu0 }
 0x158   : > { %v535_v32 = vadd.f32 %v3189_v60, %v490_v28  ;;  %v2350_v33 = vadd.f32 %v2349_v31, %v2348_v29  ;;  %2158 = vmatmul.mubr.msk.f32.gmra.mrb[18].mxu1 %vm624_vm0, %v3274_v27  ;;  %2416 = vmatmul.mubr.msk.f32.gmra.mrb[40].mxu0 %vm624_vm0, %v3274_v27 }
 0x159   : > { %797 = vmatprep.mubr.f32.mxu1 %v2919_v52 }
 0x15a   : > { %v3283_v35 = vmax.f32 %v535_v32, 0.0  ;;  %v495_v36 = vadd.f32 %v2350_v33, %v368_v30  ;;  %v2351_v37 = vpop.f32.mrb[24].mxu0 }
 0x15b   : > { %v2352_v39 = vpop.f32.mrb[25].mxu0 }
 0x15c   : > { %v536_v40 = vadd.f32 %v3189_v60, %v495_v36  ;;  %v2353_v41 = vadd.f32 %v2352_v39, %v2351_v37  ;;  %2159 = vmatmul.mubr.msk.f32.gmra.mrb[20].mxu1 %vm624_vm0, %v3283_v35  ;;  %2418 = vmatprep.mubr.msk.f32.mxu0 %vm624_vm0, %v3283_v35 }
 0x15d   : > { %803 = vmatprep.mubr.f32.mxu1 %v2919_v52 }
 0x15e   : > { %v552_v42 = vmax.f32 %v536_v40, 0.0  ;;  %v500_v43 = vadd.f32 %v2353_v41, %v369_v38  ;;  %v2354_v44 = vpop.f32.mrb[26].mxu0 }
 0x15f   : > { %v2355_v47 = vpop.f32.mrb[27].mxu0 }
 0x160   : > { %v537_v48 = vadd.f32 %v3189_v60, %v500_v43  ;;  %v2356_v49 = vadd.f32 %v2355_v47, %v2354_v44  ;;  %2160 = vmatmul.mubr.msk.f32.gmra.mrb[22].mxu1 %vm624_vm0, %v552_v42  ;;  %2419 = vmatmul.mubr.msk.f32.gmra.mrb[42].mxu0 %vm624_vm0, %v552_v42 }
 0x161   : > { %809 = vmatprep.mubr.f32.mxu1 %v2919_v52 }
 0x162   : > { %v553_v50 = vmax.f32 %v537_v48, 0.0  ;;  %v505_v51 = vadd.f32 %v2356_v49, %v370_v46  ;;  %v2357_v54 = vpop.f32.mrb[28].mxu0 }
 0x163   : > { %v2358_v56 = vpop.f32.mrb[29].mxu0 }
 0x164   : > { %v538_v57 = vadd.f32 %v3189_v60, %v505_v51  ;;  %v2359_v58 = vadd.f32 %v2358_v56, %v2357_v54  ;;  %2161 = vmatmul.mubr.msk.f32.gmra.mrb[24].mxu1 %vm624_vm0, %v553_v50  ;;  %2421 = vmatprep.mubr.msk.f32.mxu0 %vm624_vm0, %v553_v50 }
 0x165   : > { %815 = vmatprep.mubr.f32.mxu1 %v2919_v52 }
 0x166   : > { %v554_v59 = vmax.f32 %v538_v57, 0.0  ;;  %v510_v62 = vadd.f32 %v2359_v58, %v371_v55  ;;  %v2360_v63 = vpop.f32.mrb[30].mxu0 }
 0x167   : > { %v2361_v1 = vpop.f32.mrb[31].mxu0 }
 0x168   : > { %v539_v2 = vadd.f32 %v3189_v60, %v510_v62  ;;  %v2362_v3 = vadd.f32 %v2361_v1, %v2360_v63  ;;  %2162 = vmatmul.mubr.msk.f32.gmra.mrb[26].mxu1 %vm624_vm0, %v554_v59  ;;  %2422 = vmatmul.mubr.msk.f32.gmra.mrb[44].mxu0 %vm624_vm0, %v554_v59 }
 0x169   : > { %821 = vmatprep.mubr.f32.mxu1 %v2919_v52 }
 0x16a   : > { %v555_v5 = vmax.f32 %v539_v2, 0.0  ;;  %v515_v6 = vadd.f32 %v2362_v3, %v372_v0 }
 0x16c   : > { %v540_v7 = vadd.f32 %v3189_v60, %v515_v6  ;;  %2163 = vmatmul.mubr.msk.f32.gmra.mrb[28].mxu1 %vm624_vm0, %v555_v5  ;;  %2424 = vmatprep.mubr.msk.f32.mxu0 %vm624_vm0, %v555_v5  ;;  %v599_v60 = vlaneseq }
 0x16d   : > { %827 = vmatprep.mubr.f32.mxu1 %v2919_v52 }
 0x16e   : > { %v556_v9 = vmax.f32 %v540_v7, 0.0 }
 0x170   : > { %2164 = vmatmul.mubr.msk.f32.gmra.mrb[30].mxu1 %vm624_vm0, %v556_v9  ;;  %2425 = vmatmul.mubr.msk.f32.gmra.mrb[46].mxu0 %vm624_vm0, %v556_v9 }
 0x171   : > { %898 = vmatprep.mubr.f32.mxu1 %v2919_v52 }
 0x174   : > { %2165 = vmatmul.mubr.msk.f32.vlgmr.msra.gmra.mrb[32].mxu1 %vm624_vm0, %v3193_v8  ;;  %v3356_v8 = vshrl.u32 %v599_v60, 7 }
 0x175   : > { %904 = vmatprep.mubr.f32.mxu1 %v2919_v52 }
 0x178   : > { %2166 = vmatmul.mubr.msk.f32.gmra.mrb[34].mxu1 %vm624_vm0, %v3202_v21  ;;  %v601_v21 = vsub.s32 0, %v3356_v8 }
 0x179   : > { %910 = vmatprep.mubr.f32.mxu1 %v2919_v52 }
 0x17c   : > { %2167 = vmatmul.mubr.msk.f32.gmra.mrb[36].mxu1 %vm624_vm0, %v3211_v34  ;;  %v3362_v34 = vld [vmem:[%s3609_s5] sm:$0x1f] }
 0x17d   : > { %916 = vmatprep.mubr.f32.mxu1 %v2919_v52 }
 0x180   : > { %2168 = vmatmul.mubr.msk.f32.gmra.mrb[38].mxu1 %vm624_vm0, %v3220_v45  ;;  %v605_v45 = vsub.s32 1, %v3356_v8 }
 0x181   : > { %922 = vmatprep.mubr.f32.mxu1 %v2919_v52 }
 0x184   : > { %2169 = vmatmul.mubr.msk.f32.gmra.mrb[40].mxu1 %vm624_vm0, %v3229_v53  ;;  %v3367_v53 = vrot.slane %v3362_v34, %v601_v21 }
 0x185   : > { %928 = vmatprep.mubr.f32.mxu1 %v2919_v52 }
 0x188   : > { %2170 = vmatmul.mubr.msk.f32.gmra.mrb[42].mxu1 %vm624_vm0, %v3238_v61  ;;  %v3371_v61 = vrot.slane %v3362_v34, %v605_v45 }
 0x189   : > { %934 = vmatprep.mubr.f32.mxu1 %v2919_v52 }
 0x18c   : > { %2171 = vmatmul.mubr.msk.f32.gmra.mrb[44].mxu1 %vm624_vm0, %v3247_v4 }
 0x18d   : > { %940 = vmatprep.mubr.f32.mxu1 %v2919_v52 }
 0x190   : > { %2172 = vmatmul.mubr.msk.f32.gmra.mrb[46].mxu1 %vm624_vm0, %v3256_v12 }
 0x191   : > { %946 = vmatprep.mubr.f32.mxu1 %v2919_v52 }
 0x194   : > { %2173 = vmatmul.mubr.msk.f32.gmra.mrb[48].mxu1 %vm624_vm0, %v3265_v19 }
 0x195   : > { %952 = vmatprep.mubr.f32.mxu1 %v2919_v52 }
 0x198   : > { %2174 = vmatmul.mubr.msk.f32.gmra.mrb[50].mxu1 %vm624_vm0, %v3274_v27 }
 0x199   : > { %958 = vmatprep.mubr.f32.mxu1 %v2919_v52 }
 0x19c   : > { %2175 = vmatmul.mubr.msk.f32.gmra.mrb[52].mxu1 %vm624_vm0, %v3283_v35 }
 0x19d   : > { %964 = vmatprep.mubr.f32.mxu1 %v2919_v52 }
 0x1a0   : > { %2176 = vmatmul.mubr.msk.f32.gmra.mrb[54].mxu1 %vm624_vm0, %v552_v42 }
 0x1a1   : > { %970 = vmatprep.mubr.f32.mxu1 %v2919_v52 }
 0x1a4   : > { %2177 = vmatmul.mubr.msk.f32.gmra.mrb[56].mxu1 %vm624_vm0, %v553_v50 }
 0x1a5   : > { %976 = vmatprep.mubr.f32.mxu1 %v2919_v52 }
 0x1a8   : > { %2178 = vmatmul.mubr.msk.f32.gmra.mrb[58].mxu1 %vm624_vm0, %v554_v59 }
 0x1a9   : > { %982 = vmatprep.mubr.f32.mxu1 %v2919_v52 }
 0x1ac   : > { %2179 = vmatmul.mubr.msk.f32.gmra.mrb[60].mxu1 %vm624_vm0, %v555_v5 }
 0x1ad   : > { %988 = vmatprep.mubr.f32.mxu1 %v2919_v52  ;;  %v617_v52 = vsub.s32 4, %v3356_v8 }
 0x1af   : > { %v3377_v12 = vrot.slane %v3362_v34, %v617_v52 }
 0x1b0   : > { %2180 = vmatmul.mubr.msk.f32.gmra.mrb[62].mxu1 %vm624_vm0, %v556_v9 }
 0x207   : > { %v739_v4 = vpop.f32.mrb[0].mxu1 }
 0x208   : > { %v740_v10 = vadd.f32 %v739_v4, %v3367_v53  ;;  %v741_v11 = vpop.f32.mrb[1].mxu1 }
 0x209   : > { %v742_v13 = vadd.f32 %v741_v11, %v3371_v61 }
 0x20a   : > { %v2197_v14 = vmul.f32 -1.442695, %v740_v10 }
 0x20b   : > { %v2198_v15 = vmul.f32 -1.442695, %v742_v13  ;;  %v745_v16 = vpop.f32.mrb[2].mxu1  ;;  %v2405_v17 = vpop.f32.mrb[32].mxu0 }
 0x20c   : > { %2564 = vpow2.f32 %v2197_v14  ;;  %v746_v18 = vadd.f32 %v745_v16, %v3367_v53  ;;  %v1067_v19 = vadd.f32 %v2405_v17, %v3377_v12  ;;  %v747_v20 = vpop.f32.mrb[3].mxu1  ;;  %v1061_v22 = vpop.f32.mrb[33].mxu0 }
 0x20d   : > { %2566 = vpow2.f32 %v2198_v15  ;;  %v748_v23 = vadd.f32 %v747_v20, %v3371_v61  ;;  %v1062_v24 = vadd.f32 %v1061_v22, %v3377_v12 }
 0x20e   : > { %v2202_v25 = vmul.f32 -1.442695, %v746_v18  ;;  %1965 = vst [vmem:[%s3384_s26 + $0x48] sm:$0xff] %v1067_v19 }
 0x20f   : > { %v2203_v26 = vmul.f32 -1.442695, %v748_v23  ;;  %1960 = vst [vmem:[%s3384_s26 + $0x20] sm:$0xff] %v1062_v24  ;;  %v751_v27 = vpop.f32.mrb[4].mxu1 }
 0x210   : > { %2568 = vpow2.f32 %v2202_v25  ;;  %v752_v28 = vadd.f32 %v751_v27, %v3367_v53  ;;  %v753_v29 = vpop.f32.mrb[5].mxu1 }
 0x211   : > { %2570 = vpow2.f32 %v2203_v26  ;;  %v754_v30 = vadd.f32 %v753_v29, %v3371_v61 }
 0x212   : > { %v2207_v31 = vmul.f32 -1.442695, %v752_v28 }
 0x213   : > { %v2208_v32 = vmul.f32 -1.442695, %v754_v30  ;;  %v757_v33 = vpop.f32.mrb[6].mxu1  ;;  %v2408_v35 = vpop.f32.mrb[34].mxu0 }
 0x214   : > { %2572 = vpow2.f32 %v2207_v31  ;;  %v758_v36 = vadd.f32 %v757_v33, %v3367_v53  ;;  %v1077_v37 = vadd.f32 %v2408_v35, %v3377_v12  ;;  %v759_v38 = vpop.f32.mrb[7].mxu1  ;;  %v1071_v39 = vpop.f32.mrb[35].mxu0 }
 0x215   : > { %2574 = vpow2.f32 %v2208_v32  ;;  %v760_v40 = vadd.f32 %v759_v38, %v3371_v61  ;;  %v1072_v41 = vadd.f32 %v1071_v39, %v3377_v12 }
 0x216   : > { %v2565_v42 = vpop.eup %2564  ;;  %v2212_v43 = vmul.f32 -1.442695, %v758_v36  ;;  %1975 = vst [vmem:[%s3384_s26 + $0x98] sm:$0xff] %v1077_v37 }
 0x217   : > { %v2567_v44 = vpop.eup %2566  ;;  %v1380_v46 = vadd.f32 1.0, %v2565_v42  ;;  %v2213_v47 = vmul.f32 -1.442695, %v760_v40  ;;  %1970 = vst [vmem:[%s3384_s26 + $0x70] sm:$0xff] %v1072_v41  ;;  %v763_v48 = vpop.f32.mrb[8].mxu1 }
 0x218   : > { %v1381_v49 = vadd.f32 1.0, %v2567_v44  ;;  %2576 = vpow2.f32 %v2212_v43  ;;  %v764_v50 = vadd.f32 %v763_v48, %v3367_v53  ;;  %v765_v51 = vpop.f32.mrb[9].mxu1 }
 0x219   : > { %2578 = vrcp.f32 %v1380_v46  ;;  %v766_v54 = vadd.f32 %v765_v51, %v3371_v61 }
 0x21a   : > { %v2569_v55 = vpop.eup %2568  ;;  %2580 = vrcp.f32 %v1381_v49  ;;  %v2217_v56 = vmul.f32 -1.442695, %v764_v50 }
 0x21b   : > { %v2571_v57 = vpop.eup %2570  ;;  %v1385_v58 = vadd.f32 1.0, %v2569_v55  ;;  %2582 = vpow2.f32 %v2213_v47  ;;  %v2218_v59 = vmul.f32 -1.442695, %v766_v54  ;;  %v769_v62 = vpop.f32.mrb[10].mxu1 }
 0x21c   : > { %v2411_v63 = vpop.f32.mrb[36].mxu0  ;;  %v1386_v0 = vadd.f32 1.0, %v2571_v57  ;;  %2584 = vpow2.f32 %v2217_v56  ;;  %v770_v1 = vadd.f32 %v769_v62, %v3367_v53  ;;  %v771_v3 = vpop.f32.mrb[11].mxu1 }
 0x21d   : > { %v1087_v2 = vadd.f32 %v2411_v63, %v3377_v12  ;;  %v1081_v5 = vpop.f32.mrb[37].mxu0  ;;  %2586 = vrcp.f32 %v1385_v58  ;;  %v772_v6 = vadd.f32 %v771_v3, %v3371_v61 }
 0x21e   : > { %v1082_v7 = vadd.f32 %v1081_v5, %v3377_v12  ;;  %v2573_v9 = vpop.eup %2572  ;;  %2588 = vrcp.f32 %v1386_v0  ;;  %v2222_v60 = vmul.f32 -1.442695, %v770_v1 }
 0x21f   : > { %1985 = vst [vmem:[%s3384_s26 + $0xe8] sm:$0xff] %v1087_v2  ;;  %v2575_v21 = vpop.eup %2574  ;;  %v1390_v45 = vadd.f32 1.0, %v2573_v9  ;;  %2590 = vpow2.f32 %v2218_v59  ;;  %v2223_v52 = vmul.f32 -1.442695, %v772_v6  ;;  %v775_v4 = vpop.f32.mrb[12].mxu1 }
 0x220   : > { %1980 = vst [vmem:[%s3384_s26 + $0xc0] sm:$0xff] %v1082_v7  ;;  %v1391_v10 = vadd.f32 1.0, %v2575_v21  ;;  %2592 = vpow2.f32 %v2222_v60  ;;  %v776_v11 = vadd.f32 %v775_v4, %v3367_v53  ;;  %v777_v13 = vpop.f32.mrb[13].mxu1 }
 0x221   : > { %2594 = vrcp.f32 %v1390_v45  ;;  %v778_v14 = vadd.f32 %v777_v13, %v3371_v61 }
 0x222   : > { %v2577_v15 = vpop.eup %2576  ;;  %2596 = vrcp.f32 %v1391_v10  ;;  %v2227_v16 = vmul.f32 -1.442695, %v776_v11 }
 0x223   : > { %v2579_v17 = vpop.eup %2578  ;;  %v1395_v18 = vadd.f32 1.0, %v2577_v15  ;;  %2598 = vpow2.f32 %v2223_v52  ;;  %v2228_v19 = vmul.f32 -1.442695, %v778_v14  ;;  %v781_v20 = vpop.f32.mrb[14].mxu1 }
 0x224   : > { %v2414_v22 = vpop.f32.mrb[38].mxu0  ;;  %v2581_v23 = vpop.eup %2580  ;;  %v1620_v24 = vmul.f32 0.98, %v2579_v17  ;;  %2600 = vpow2.f32 %v2227_v16  ;;  %v782_v25 = vadd.f32 %v781_v20, %v3367_v53 }
 0x225   : > { %v1097_v26 = vadd.f32 %v2414_v22, %v3377_v12  ;;  %v783_v27 = vpop.f32.mrb[15].mxu1  ;;  %v1091_v28 = vpop.f32.mrb[39].mxu0  ;;  %v1621_v30 = vmul.f32 0.98, %v2581_v23  ;;  %2602 = vrcp.f32 %v1395_v18 }
 0x226   : > { %v2583_v29 = vpop.eup %2582  ;;  %v784_v31 = vadd.f32 %v783_v27, %v3371_v61  ;;  %v1092_v32 = vadd.f32 %v1091_v28, %v3377_v12  ;;  %v1700_v35 = vadd.f32 0.01, %v1620_v24  ;;  %2604 = vpow2.f32 %v2228_v19 }
 0x227   : > { %v2585_v33 = vpop.eup %2584  ;;  %v1396_v36 = vadd.f32 1.0, %v2583_v29  ;;  %v2232_v37 = vmul.f32 -1.442695, %v782_v25  ;;  %1995 = vst [vmem:[%s3384_s26 + $0x138] sm:$0xff] %v1097_v26  ;;  %v1701_v39 = vadd.f32 0.01, %v1621_v30 }
 0x228   : > { %v2587_v38 = vpop.eup %2586  ;;  %v1400_v40 = vadd.f32 1.0, %v2585_v33  ;;  %v2233_v41 = vmul.f32 -1.442695, %v784_v31  ;;  %1990 = vst [vmem:[%s3384_s26 + $0x110] sm:$0xff] %v1092_v32  ;;  %v787_v42 = vpop.f32.mrb[16].mxu1  ;;  %1956 = vst [vmem:[%s3384_s26] sm:$0xff] %v1700_v35  ;;  %v609_v28 = vsub.s32 2, %v3356_v8 }
 0x229   : > { %v2589_v43 = vpop.eup %2588  ;;  %v1625_v44 = vmul.f32 0.98, %v2587_v38  ;;  %2606 = vrcp.f32 %v1396_v36  ;;  %v788_v46 = vadd.f32 %v787_v42, %v3367_v53  ;;  %v789_v47 = vpop.f32.mrb[17].mxu1  ;;  %1957 = vst [vmem:[%s3384_s26 + $0x8] sm:$0xff] %v1701_v39 }
 0x22a   : > { %v2591_v48 = vpop.eup %2590  ;;  %v1626_v49 = vmul.f32 0.98, %v2589_v43  ;;  %2608 = vrcp.f32 %v1400_v40  ;;  %v790_v50 = vadd.f32 %v789_v47, %v3371_v61 }
 0x22b   : > { %v2593_v51 = vpop.eup %2592  ;;  %v1705_v54 = vadd.f32 0.01, %v1625_v44  ;;  %v1401_v55 = vadd.f32 1.0, %v2591_v48  ;;  %2610 = vpow2.f32 %v2232_v37  ;;  %v2237_v56 = vmul.f32 -1.442695, %v788_v46  ;;  %v793_v63 = vpop.f32.mrb[18].mxu1 }
 0x22c   : > { %v2595_v57 = vpop.eup %2594  ;;  %v1706_v58 = vadd.f32 0.01, %v1626_v49  ;;  %v1405_v59 = vadd.f32 1.0, %v2593_v51  ;;  %2612 = vpow2.f32 %v2233_v41  ;;  %v2238_v62 = vmul.f32 -1.442695, %v790_v50  ;;  %v2417_v3 = vpop.f32.mrb[40].mxu0 }
 0x22d   : > { %v2597_v0 = vpop.eup %2596  ;;  %1961 = vst [vmem:[%s3384_s26 + $0x28] sm:$0xff] %v1705_v54  ;;  %v1630_v1 = vmul.f32 0.98, %v2595_v57  ;;  %2614 = vrcp.f32 %v1401_v55  ;;  %v794_v2 = vadd.f32 %v793_v63, %v3367_v53  ;;  %v795_v5 = vpop.f32.mrb[19].mxu1  ;;  %v1107_v9 = vadd.f32 %v2417_v3, %v3377_v12 }
 0x22e   : > { %v2599_v6 = vpop.eup %2598  ;;  %1962 = vst [vmem:[%s3384_s26 + $0x30] sm:$0xff] %v1706_v58  ;;  %v1631_v7 = vmul.f32 0.98, %v2597_v0  ;;  %2616 = vrcp.f32 %v1405_v59  ;;  %v796_v60 = vadd.f32 %v795_v5, %v3371_v61  ;;  %v1101_v21 = vpop.f32.mrb[41].mxu0  ;;  %v613_v63 = vsub.s32 3, %v3356_v8 }
 0x22f   : > { %v2601_v45 = vpop.eup %2600  ;;  %v1710_v52 = vadd.f32 0.01, %v1630_v1  ;;  %v1406_v4 = vadd.f32 1.0, %v2599_v6  ;;  %2618 = vpow2.f32 %v2237_v56  ;;  %v2242_v10 = vmul.f32 -1.442695, %v794_v2  ;;  %2005 = vst [vmem:[%s3384_s26 + $0x188] sm:$0xff] %v1107_v9 }
 0x230   : > { %v2603_v11 = vpop.eup %2602  ;;  %v1711_v13 = vadd.f32 0.01, %v1631_v7  ;;  %v1410_v14 = vadd.f32 1.0, %v2601_v45  ;;  %2620 = vpow2.f32 %v2238_v62  ;;  %v2243_v15 = vmul.f32 -1.442695, %v796_v60  ;;  %v799_v16 = vpop.f32.mrb[20].mxu1 }
 0x231   : > { %v2605_v17 = vpop.eup %2604  ;;  %1966 = vst [vmem:[%s3384_s26 + $0x50] sm:$0xff] %v1710_v52  ;;  %v1635_v18 = vmul.f32 0.98, %v2603_v11  ;;  %2622 = vrcp.f32 %v1406_v4  ;;  %v1102_v19 = vadd.f32 %v1101_v21, %v3377_v12  ;;  %v800_v20 = vadd.f32 %v799_v16, %v3367_v53  ;;  %v801_v22 = vpop.f32.mrb[21].mxu1 }
 0x232   : > { %1967 = vst [vmem:[%s3384_s26 + $0x58] sm:$0xff] %v1711_v13  ;;  %2624 = vrcp.f32 %v1410_v14  ;;  %v1411_v23 = vadd.f32 1.0, %v2605_v17  ;;  %v802_v24 = vadd.f32 %v801_v22, %v3371_v61 }
 0x233   : > { %v2607_v25 = vpop.eup %2606  ;;  %v1715_v26 = vadd.f32 0.01, %v1635_v18  ;;  %2626 = vpow2.f32 %v2242_v10  ;;  %2000 = vst [vmem:[%s3384_s26 + $0x160] sm:$0xff] %v1102_v19  ;;  %v2247_v27 = vmul.f32 -1.442695, %v800_v20  ;;  %v805_v32 = vpop.f32.mrb[22].mxu1 }
 0x234   : > { %v2609_v29 = vpop.eup %2608  ;;  %v1636_v30 = vmul.f32 0.98, %v2607_v25  ;;  %2628 = vrcp.f32 %v1411_v23  ;;  %v2248_v31 = vmul.f32 -1.442695, %v802_v24  ;;  %v2420_v33 = vpop.f32.mrb[42].mxu0  ;;  %v806_v37 = vadd.f32 %v805_v32, %v3367_v53 }
 0x235   : > { %v2611_v35 = vpop.eup %2610  ;;  %1971 = vst [vmem:[%s3384_s26 + $0x78] sm:$0xff] %v1715_v26  ;;  %v1640_v36 = vmul.f32 0.98, %v2609_v29  ;;  %2630 = vpow2.f32 %v2243_v15  ;;  %v1117_v38 = vadd.f32 %v2420_v33, %v3377_v12  ;;  %v807_v39 = vpop.f32.mrb[23].mxu1 }
 0x236   : > { %v1111_v40 = vpop.f32.mrb[43].mxu0  ;;  %v2613_v41 = vpop.eup %2612  ;;  %v1716_v42 = vadd.f32 0.01, %v1636_v30  ;;  %v1415_v43 = vadd.f32 1.0, %v2611_v35  ;;  %2632 = vpow2.f32 %v2247_v27  ;;  %v808_v44 = vadd.f32 %v807_v39, %v3371_v61 }
 0x237   : > { %v2615_v46 = vpop.eup %2614  ;;  %v1720_v47 = vadd.f32 0.01, %v1640_v36  ;;  %v1416_v48 = vadd.f32 1.0, %v2613_v41  ;;  %2634 = vpow2.f32 %v2248_v31  ;;  %v2252_v49 = vmul.f32 -1.442695, %v806_v37  ;;  %2015 = vst [vmem:[%s3384_s26 + $0x1d8] sm:$0xff] %v1117_v38 }
 0x238   : > { %v2617_v50 = vpop.eup %2616  ;;  %1972 = vst [vmem:[%s3384_s26 + $0x80] sm:$0xff] %v1716_v42  ;;  %v1641_v51 = vmul.f32 0.98, %v2615_v46  ;;  %2636 = vrcp.f32 %v1415_v43  ;;  %v2253_v54 = vmul.f32 -1.442695, %v808_v44  ;;  %v1112_v55 = vadd.f32 %v1111_v40, %v3377_v12  ;;  %v811_v56 = vpop.f32.mrb[24].mxu1 }
 0x239   : > { %v2619_v57 = vpop.eup %2618  ;;  %1976 = vst [vmem:[%s3384_s26 + $0xa0] sm:$0xff] %v1720_v47  ;;  %v1645_v58 = vmul.f32 0.98, %v2617_v50  ;;  %2638 = vrcp.f32 %v1416_v48  ;;  %v812_v59 = vadd.f32 %v811_v56, %v3367_v53  ;;  %v813_v62 = vpop.f32.mrb[25].mxu1  ;;  %v3457_v44 = vrot.slane %v3362_v34, %v609_v28 }
 0x23a   : > { %v2621_v0 = vpop.eup %2620  ;;  %v1721_v1 = vadd.f32 0.01, %v1641_v51  ;;  %v1420_v2 = vadd.f32 1.0, %v2619_v57  ;;  %2640 = vpow2.f32 %v2252_v49  ;;  %2010 = vst [vmem:[%s3384_s26 + $0x1b0] sm:$0xff] %v1112_v55  ;;  %v814_v3 = vadd.f32 %v813_v62, %v3371_v61 }
 0x23b   : > { %v2623_v5 = vpop.eup %2622  ;;  %v1725_v6 = vadd.f32 0.01, %v1645_v58  ;;  %v1421_v7 = vadd.f32 1.0, %v2621_v0  ;;  %2642 = vpow2.f32 %v2253_v54  ;;  %v2257_v9 = vmul.f32 -1.442695, %v812_v59  ;;  %v817_v52 = vpop.f32.mrb[26].mxu1 }
 0x23c   : > { %v2625_v60 = vpop.eup %2624  ;;  %1977 = vst [vmem:[%s3384_s26 + $0xa8] sm:$0xff] %v1721_v1  ;;  %v1646_v21 = vmul.f32 0.98, %v2623_v5  ;;  %2644 = vrcp.f32 %v1420_v2  ;;  %v2258_v45 = vmul.f32 -1.442695, %v814_v3  ;;  %v2423_v4 = vpop.f32.mrb[44].mxu0  ;;  %v818_v13 = vadd.f32 %v817_v52, %v3367_v53 }
 0x23d   : > { %v2627_v10 = vpop.eup %2626  ;;  %1981 = vst [vmem:[%s3384_s26 + $0xc8] sm:$0xff] %v1725_v6  ;;  %v1650_v11 = vmul.f32 0.98, %v2625_v60  ;;  %2646 = vrcp.f32 %v1421_v7  ;;  %v1127_v14 = vadd.f32 %v2423_v4, %v3377_v12  ;;  %v819_v15 = vpop.f32.mrb[27].mxu1  ;;  %v3462_v51 = vrot.slane %v3362_v34, %v613_v63 }
 0x23e   : > { %v1121_v16 = vpop.f32.mrb[45].mxu0  ;;  %v2629_v17 = vpop.eup %2628  ;;  %v1726_v18 = vadd.f32 0.01, %v1646_v21  ;;  %v1425_v19 = vadd.f32 1.0, %v2627_v10  ;;  %2648 = vpow2.f32 %v2257_v9  ;;  %v820_v20 = vadd.f32 %v819_v15, %v3371_v61 }
 0x23f   : > { %v2631_v22 = vpop.eup %2630  ;;  %v1730_v23 = vadd.f32 0.01, %v1650_v11  ;;  %v1651_v24 = vmul.f32 0.98, %v2629_v17  ;;  %2650 = vpow2.f32 %v2258_v45  ;;  %v2262_v25 = vmul.f32 -1.442695, %v818_v13 }
 0x240   : > { %2025 = vst [vmem:[%s3384_s26 + $0x228] sm:$0xff] %v1127_v14  ;;  %v2633_v26 = vpop.eup %2632  ;;  %1982 = vst [vmem:[%s3384_s26 + $0xd0] sm:$0xff] %v1726_v18  ;;  %2652 = vrcp.f32 %v1425_v19  ;;  %v1426_v27 = vadd.f32 1.0, %v2631_v22  ;;  %v2263_v29 = vmul.f32 -1.442695, %v820_v20  ;;  %v1122_v30 = vadd.f32 %v1121_v16, %v3377_v12  ;;  %v823_v31 = vpop.f32.mrb[28].mxu1 }
 0x241   : > { %v2635_v32 = vpop.eup %2634  ;;  %1986 = vst [vmem:[%s3384_s26 + $0xf0] sm:$0xff] %v1730_v23  ;;  %v1731_v33 = vadd.f32 0.01, %v1651_v24  ;;  %v1430_v35 = vadd.f32 1.0, %v2633_v26  ;;  %2654 = vpow2.f32 %v2262_v25  ;;  %v824_v36 = vadd.f32 %v823_v31, %v3367_v53  ;;  %v825_v37 = vpop.f32.mrb[29].mxu1 }
 0x242   : > { %v2637_v38 = vpop.eup %2636  ;;  %2656 = vrcp.f32 %v1426_v27  ;;  %v1431_v39 = vadd.f32 1.0, %v2635_v32  ;;  %2020 = vst [vmem:[%s3384_s26 + $0x200] sm:$0xff] %v1122_v30  ;;  %v826_v40 = vadd.f32 %v825_v37, %v3371_v61 }
 0x243   : > { %v2639_v41 = vpop.eup %2638  ;;  %1987 = vst [vmem:[%s3384_s26 + $0xf8] sm:$0xff] %v1731_v33  ;;  %v1655_v42 = vmul.f32 0.98, %v2637_v38  ;;  %2658 = vrcp.f32 %v1430_v35  ;;  %v2267_v43 = vmul.f32 -1.442695, %v824_v36  ;;  %v829_v49 = vpop.f32.mrb[30].mxu1 }
 0x244   : > { %v2641_v46 = vpop.eup %2640  ;;  %v1656_v47 = vmul.f32 0.98, %v2639_v41  ;;  %2660 = vrcp.f32 %v1431_v39  ;;  %v2268_v48 = vmul.f32 -1.442695, %v826_v40  ;;  %v2426_v50 = vpop.f32.mrb[46].mxu0  ;;  %v830_v28 = vadd.f32 %v829_v49, %v3367_v53 }
 0x245   : > { %v2643_v54 = vpop.eup %2642  ;;  %v1735_v55 = vadd.f32 0.01, %v1655_v42  ;;  %v1435_v56 = vadd.f32 1.0, %v2641_v46  ;;  %2662 = vpow2.f32 %v2263_v29  ;;  %v831_v57 = vpop.f32.mrb[31].mxu1  ;;  %v1137_v1 = vadd.f32 %v2426_v50, %v3377_v12 }
 0x246   : > { %v1131_v58 = vpop.f32.mrb[47].mxu0  ;;  %v2645_v59 = vpop.eup %2644  ;;  %v1736_v62 = vadd.f32 0.01, %v1656_v47  ;;  %v1436_v0 = vadd.f32 1.0, %v2643_v54  ;;  %2664 = vpow2.f32 %v2267_v43  ;;  %v2272_v63 = vmul.f32 -1.442695, %v830_v28 }
 0x247   : > { %v2647_v8 = vpop.eup %2646  ;;  %1991 = vst [vmem:[%s3384_s26 + $0x118] sm:$0xff] %v1735_v55  ;;  %v1660_v34 = vmul.f32 0.98, %v2645_v59  ;;  %2666 = vrcp.f32 %v1435_v56  ;;  %v832_v2 = vadd.f32 %v831_v57, %v3371_v61  ;;  %2035 = vst [vmem:[%s3384_s26 + $0x278] sm:$0xff] %v1137_v1  ;;  %v1132_v5 = vadd.f32 %v1131_v58, %v3377_v12  ;;  %v900_v6 = vpop.f32.mrb[32].mxu1 }
 0x248   : > { %v2649_v3 = vpop.eup %2648  ;;  %1992 = vst [vmem:[%s3384_s26 + $0x120] sm:$0xff] %v1736_v62  ;;  %v1661_v53 = vmul.f32 0.98, %v2647_v8  ;;  %2668 = vrcp.f32 %v1436_v0  ;;  %v902_v45 = vpop.f32.mrb[33].mxu1  ;;  %v901_v10 = vadd.f32 %v900_v6, %v3457_v44 }
 0x249   : > { %v2651_v7 = vpop.eup %2650  ;;  %v1740_v9 = vadd.f32 0.01, %v1660_v34  ;;  %v1440_v60 = vadd.f32 1.0, %v2649_v3  ;;  %2670 = vpow2.f32 %v2268_v48  ;;  %v2273_v21 = vmul.f32 -1.442695, %v832_v2  ;;  %2030 = vst [vmem:[%s3384_s26 + $0x250] sm:$0xff] %v1132_v5 }
 0x24a   : > { %v2653_v52 = vpop.eup %2652  ;;  %v1741_v4 = vadd.f32 0.01, %v1661_v53  ;;  %v1441_v61 = vadd.f32 1.0, %v2651_v7  ;;  %2672 = vpow2.f32 %v2272_v63  ;;  %v903_v12 = vadd.f32 %v902_v45, %v3462_v51 }
 0x24b   : > { %v2655_v11 = vpop.eup %2654  ;;  %1996 = vst [vmem:[%s3384_s26 + $0x140] sm:$0xff] %v1740_v9  ;;  %v1665_v13 = vmul.f32 0.98, %v2653_v52  ;;  %2674 = vrcp.f32 %v1440_v60  ;;  %v2199_v16 = vmul.f32 -1.442695, %v901_v10  ;;  %v906_v17 = vpop.f32.mrb[34].mxu1 }
 0x24c   : > { %v2657_v14 = vpop.eup %2656  ;;  %1997 = vst [vmem:[%s3384_s26 + $0x148] sm:$0xff] %v1741_v4  ;;  %2676 = vrcp.f32 %v1441_v61  ;;  %v1445_v15 = vadd.f32 1.0, %v2655_v11  ;;  %v2200_v22 = vmul.f32 -1.442695, %v903_v12  ;;  %v907_v25 = vadd.f32 %v906_v17, %v3457_v44  ;;  %v908_v26 = vpop.f32.mrb[35].mxu1 }
 0x24d   : > { %v2659_v18 = vpop.eup %2658  ;;  %v1745_v19 = vadd.f32 0.01, %v1665_v13  ;;  %v1666_v20 = vmul.f32 0.98, %v2657_v14  ;;  %2678 = vpow2.f32 %v2273_v21  ;;  %v909_v31 = vadd.f32 %v908_v26, %v3462_v51 }
 0x24e   : > { %v2661_v23 = vpop.eup %2660  ;;  %v1670_v24 = vmul.f32 0.98, %v2659_v18  ;;  %2680 = vrcp.f32 %v1445_v15  ;;  %v2204_v36 = vmul.f32 -1.442695, %v907_v25 }
 0x24f   : > { %v2663_v27 = vpop.eup %2662  ;;  %2001 = vst [vmem:[%s3384_s26 + $0x168] sm:$0xff] %v1745_v19  ;;  %v1746_v29 = vadd.f32 0.01, %v1666_v20  ;;  %v1671_v30 = vmul.f32 0.98, %v2661_v23  ;;  %2682 = vpow2.f32 %v2199_v16  ;;  %v912_v37 = vpop.f32.mrb[36].mxu1 }
 0x250   : > { %v2665_v32 = vpop.eup %2664  ;;  %v1750_v33 = vadd.f32 0.01, %v1670_v24  ;;  %v1446_v35 = vadd.f32 1.0, %v2663_v27  ;;  %2684 = vpow2.f32 %v2200_v22  ;;  %v2205_v41 = vmul.f32 -1.442695, %v909_v31  ;;  %v914_v43 = vpop.f32.mrb[37].mxu1 }
 0x251   : > { %v2667_v38 = vpop.eup %2666  ;;  %2002 = vst [vmem:[%s3384_s26 + $0x170] sm:$0xff] %v1746_v29  ;;  %v1751_v39 = vadd.f32 0.01, %v1671_v30  ;;  %v1450_v40 = vadd.f32 1.0, %v2665_v32  ;;  %v913_v42 = vadd.f32 %v912_v37, %v3457_v44  ;;  %v915_v48 = vadd.f32 %v914_v43, %v3462_v51 }
 0x252   : > { %v2669_v46 = vpop.eup %2668  ;;  %2006 = vst [vmem:[%s3384_s26 + $0x190] sm:$0xff] %v1750_v33  ;;  %v1675_v47 = vmul.f32 0.98, %v2667_v38  ;;  %2686 = vrcp.f32 %v1446_v35 }
 0x253   : > { %v2671_v49 = vpop.eup %2670  ;;  %2007 = vst [vmem:[%s3384_s26 + $0x198] sm:$0xff] %v1751_v39  ;;  %v1676_v50 = vmul.f32 0.98, %v2669_v46  ;;  %2688 = vrcp.f32 %v1450_v40  ;;  %v2209_v54 = vmul.f32 -1.442695, %v913_v42  ;;  %v918_v58 = vpop.f32.mrb[38].mxu1 }
 0x254   : > { %v2673_v55 = vpop.eup %2672  ;;  %v1755_v56 = vadd.f32 0.01, %v1675_v47  ;;  %v1451_v28 = vadd.f32 1.0, %v2671_v49  ;;  %2690 = vpow2.f32 %v2204_v36  ;;  %v2210_v57 = vmul.f32 -1.442695, %v915_v48  ;;  %v920_v8 = vpop.f32.mrb[39].mxu1 }
 0x255   : > { %v2675_v59 = vpop.eup %2674  ;;  %v1756_v62 = vadd.f32 0.01, %v1676_v50  ;;  %v1455_v0 = vadd.f32 1.0, %v2673_v55  ;;  %2692 = vpow2.f32 %v2205_v41  ;;  %v919_v1 = vadd.f32 %v918_v58, %v3457_v44 }
 0x256   : > { %v2677_v34 = vpop.eup %2676  ;;  %2011 = vst [vmem:[%s3384_s26 + $0x1b8] sm:$0xff] %v1755_v56  ;;  %v1680_v63 = vmul.f32 0.98, %v2675_v59  ;;  %2694 = vrcp.f32 %v1451_v28  ;;  %v921_v2 = vadd.f32 %v920_v8, %v3462_v51 }
 0x257   : > { %v2679_v3 = vpop.eup %2678  ;;  %2012 = vst [vmem:[%s3384_s26 + $0x1c0] sm:$0xff] %v1756_v62  ;;  %v1681_v53 = vmul.f32 0.98, %v2677_v34  ;;  %2696 = vrcp.f32 %v1455_v0  ;;  %v2214_v5 = vmul.f32 -1.442695, %v919_v1  ;;  %v924_v60 = vpop.f32.mrb[40].mxu1 }
 0x258   : > { %v2681_v6 = vpop.eup %2680  ;;  %v1760_v7 = vadd.f32 0.01, %v1680_v63  ;;  %v1456_v9 = vadd.f32 1.0, %v2679_v3  ;;  %2698 = vpow2.f32 %v2209_v54  ;;  %v925_v4 = vadd.f32 %v924_v60, %v3457_v44  ;;  %v926_v61 = vpop.f32.mrb[41].mxu1 }
 0x259   : > { %v2683_v21 = vpop.eup %2682  ;;  %v1761_v45 = vadd.f32 0.01, %v1681_v53  ;;  %v1685_v52 = vmul.f32 0.98, %v2681_v6  ;;  %2700 = vpow2.f32 %v2210_v57  ;;  %v2215_v13 = vmul.f32 -1.442695, %v921_v2 }
 0x25a   : > { %v2685_v10 = vpop.eup %2684  ;;  %2016 = vst [vmem:[%s3384_s26 + $0x1e0] sm:$0xff] %v1760_v7  ;;  %2702 = vrcp.f32 %v1456_v9  ;;  %v1382_v11 = vadd.f32 1.0, %v2683_v21  ;;  %v927_v12 = vadd.f32 %v926_v61, %v3462_v51  ;;  %v2219_v16 = vmul.f32 -1.442695, %v925_v4 }
 0x25b   : > { %2017 = vst [vmem:[%s3384_s26 + $0x1e8] sm:$0xff] %v1761_v45  ;;  %v1765_v14 = vadd.f32 0.01, %v1685_v52  ;;  %v1383_v15 = vadd.f32 1.0, %v2685_v10  ;;  %2704 = vpow2.f32 %v2214_v5  ;;  %v930_v19 = vpop.f32.mrb[42].mxu1 }
 0x25c   : > { %v2687_v17 = vpop.eup %2686  ;;  %2706 = vrcp.f32 %v1382_v11  ;;  %v2220_v18 = vmul.f32 -1.442695, %v927_v12  ;;  %v931_v23 = vadd.f32 %v930_v19, %v3457_v44  ;;  %v932_v24 = vpop.f32.mrb[43].mxu1 }
 0x25d   : > { %v2689_v20 = vpop.eup %2688  ;;  %2021 = vst [vmem:[%s3384_s26 + $0x208] sm:$0xff] %v1765_v14  ;;  %v1686_v22 = vmul.f32 0.98, %v2687_v17  ;;  %2708 = vrcp.f32 %v1383_v15  ;;  %v933_v27 = vadd.f32 %v932_v24, %v3462_v51 }
 0x25e   : > { %v2691_v25 = vpop.eup %2690  ;;  %v1690_v26 = vmul.f32 0.98, %v2689_v20  ;;  %2710 = vpow2.f32 %v2215_v13  ;;  %v2224_v32 = vmul.f32 -1.442695, %v931_v23 }
 0x25f   : > { %v2693_v29 = vpop.eup %2692  ;;  %v1766_v30 = vadd.f32 0.01, %v1686_v22  ;;  %v1387_v31 = vadd.f32 1.0, %v2691_v25  ;;  %2712 = vpow2.f32 %v2219_v16  ;;  %v2225_v37 = vmul.f32 -1.442695, %v933_v27  ;;  %v936_v38 = vpop.f32.mrb[44].mxu1 }
 0x260   : > { %v2695_v33 = vpop.eup %2694  ;;  %v1770_v35 = vadd.f32 0.01, %v1690_v26  ;;  %v1388_v36 = vadd.f32 1.0, %v2693_v29  ;;  %2714 = vpow2.f32 %v2220_v18  ;;  %v937_v41 = vadd.f32 %v936_v38, %v3457_v44  ;;  %v938_v42 = vpop.f32.mrb[45].mxu1 }
 0x261   : > { %v2697_v39 = vpop.eup %2696  ;;  %2022 = vst [vmem:[%s3384_s26 + $0x210] sm:$0xff] %v1766_v30  ;;  %v1691_v40 = vmul.f32 0.98, %v2695_v33  ;;  %2716 = vrcp.f32 %v1387_v31  ;;  %v939_v47 = vadd.f32 %v938_v42, %v3462_v51 }
 0x262   : > { %v2699_v43 = vpop.eup %2698  ;;  %2026 = vst [vmem:[%s3384_s26 + $0x230] sm:$0xff] %v1770_v35  ;;  %v1695_v46 = vmul.f32 0.98, %v2697_v39  ;;  %2718 = vrcp.f32 %v1388_v36  ;;  %v2229_v54 = vmul.f32 -1.442695, %v937_v41 }
 0x263   : > { %v2701_v48 = vpop.eup %2700  ;;  %v1771_v49 = vadd.f32 0.01, %v1691_v40  ;;  %v1392_v50 = vadd.f32 1.0, %v2699_v43  ;;  %2720 = vpow2.f32 %v2224_v32  ;;  %v942_v57 = vpop.f32.mrb[46].mxu1  ;;  %v2230_v62 = vmul.f32 -1.442695, %v939_v47 }
 0x264   : > { %v2703_v55 = vpop.eup %2702  ;;  %v1775_v56 = vadd.f32 0.01, %v1695_v46  ;;  %v1393_v28 = vadd.f32 1.0, %v2701_v48  ;;  %2722 = vpow2.f32 %v2225_v37  ;;  %v943_v0 = vadd.f32 %v942_v57, %v3457_v44  ;;  %v944_v1 = vpop.f32.mrb[47].mxu1 }
 0x265   : > { %v2705_v58 = vpop.eup %2704  ;;  %2027 = vst [vmem:[%s3384_s26 + $0x238] sm:$0xff] %v1771_v49  ;;  %v1696_v59 = vmul.f32 0.98, %v2703_v55  ;;  %2724 = vrcp.f32 %v1392_v50  ;;  %v945_v63 = vadd.f32 %v944_v1, %v3462_v51 }
 0x266   : > { %v2707_v8 = vpop.eup %2706  ;;  %2031 = vst [vmem:[%s3384_s26 + $0x258] sm:$0xff] %v1775_v56  ;;  %2726 = vrcp.f32 %v1393_v28  ;;  %v1397_v34 = vadd.f32 1.0, %v2705_v58  ;;  %v2234_v53 = vmul.f32 -1.442695, %v943_v0 }
 0x267   : > { %v2709_v2 = vpop.eup %2708  ;;  %v1776_v3 = vadd.f32 0.01, %v1696_v59  ;;  %1958 = vst [vmem:[%s3384_s26 + $0x10] sm:$0xff] %v2707_v8  ;;  %2728 = vpow2.f32 %v2229_v54  ;;  %v948_v6 = vpop.f32.mrb[48].mxu1  ;;  %v2235_v4 = vmul.f32 -1.442695, %v945_v63 }
 0x268   : > { %v2711_v5 = vpop.eup %2710  ;;  %1959 = vst [vmem:[%s3384_s26 + $0x18] sm:$0xff] %v2709_v2  ;;  %2730 = vrcp.f32 %v1397_v34  ;;  %v949_v60 = vadd.f32 %v948_v6, %v3457_v44  ;;  %v950_v21 = vpop.f32.mrb[49].mxu1 }
 0x269   : > { %v2713_v7 = vpop.eup %2712  ;;  %2032 = vst [vmem:[%s3384_s26 + $0x260] sm:$0xff] %v1776_v3  ;;  %v1398_v9 = vadd.f32 1.0, %v2711_v5  ;;  %2732 = vpow2.f32 %v2230_v62  ;;  %v951_v61 = vadd.f32 %v950_v21, %v3462_v51 }
 0x26a   : > { %v2715_v45 = vpop.eup %2714  ;;  %v1402_v52 = vadd.f32 1.0, %v2713_v7  ;;  %2734 = vpow2.f32 %v2234_v53  ;;  %v2239_v13 = vmul.f32 -1.442695, %v949_v60 }
 0x26b   : > { %v2717_v10 = vpop.eup %2716  ;;  %2736 = vrcp.f32 %v1398_v9  ;;  %v1403_v11 = vadd.f32 1.0, %v2715_v45  ;;  %v954_v14 = vpop.f32.mrb[50].mxu1  ;;  %v2240_v20 = vmul.f32 -1.442695, %v951_v61 }
 0x26c   : > { %v2719_v12 = vpop.eup %2718  ;;  %1963 = vst [vmem:[%s3384_s26 + $0x38] sm:$0xff] %v2717_v10  ;;  %2738 = vrcp.f32 %v1402_v52  ;;  %v955_v16 = vadd.f32 %v954_v14, %v3457_v44  ;;  %v956_v17 = vpop.f32.mrb[51].mxu1 }
 0x26d   : > { %v2721_v15 = vpop.eup %2720  ;;  %1964 = vst [vmem:[%s3384_s26 + $0x40] sm:$0xff] %v2719_v12  ;;  %2740 = vrcp.f32 %v1403_v11  ;;  %v957_v22 = vadd.f32 %v956_v17, %v3462_v51 }
 0x26e   : > { %v2723_v18 = vpop.eup %2722  ;;  %v1407_v19 = vadd.f32 1.0, %v2721_v15  ;;  %2742 = vpow2.f32 %v2235_v4  ;;  %v2244_v25 = vmul.f32 -1.442695, %v955_v16 }
 0x26f   : > { %v2725_v23 = vpop.eup %2724  ;;  %v1408_v24 = vadd.f32 1.0, %v2723_v18  ;;  %2744 = vpow2.f32 %v2239_v13  ;;  %v960_v27 = vpop.f32.mrb[52].mxu1  ;;  %v2245_v30 = vmul.f32 -1.442695, %v957_v22 }
 0x270   : > { %v2727_v26 = vpop.eup %2726  ;;  %1968 = vst [vmem:[%s3384_s26 + $0x60] sm:$0xff] %v2725_v23  ;;  %2746 = vrcp.f32 %v1407_v19  ;;  %v961_v31 = vadd.f32 %v960_v27, %v3457_v44  ;;  %v962_v32 = vpop.f32.mrb[53].mxu1 }
 0x271   : > { %v2729_v29 = vpop.eup %2728  ;;  %1969 = vst [vmem:[%s3384_s26 + $0x68] sm:$0xff] %v2727_v26  ;;  %2748 = vrcp.f32 %v1408_v24  ;;  %v963_v36 = vadd.f32 %v962_v32, %v3462_v51 }
 0x272   : > { %v2731_v33 = vpop.eup %2730  ;;  %v1412_v35 = vadd.f32 1.0, %v2729_v29  ;;  %2750 = vpow2.f32 %v2240_v20  ;;  %v2249_v40 = vmul.f32 -1.442695, %v961_v31 }
 0x273   : > { %v2733_v37 = vpop.eup %2732  ;;  %1973 = vst [vmem:[%s3384_s26 + $0x88] sm:$0xff] %v2731_v33  ;;  %2752 = vpow2.f32 %v2244_v25  ;;  %v966_v41 = vpop.f32.mrb[54].mxu1  ;;  %v2250_v46 = vmul.f32 -1.442695, %v963_v36 }
 0x274   : > { %v2735_v38 = vpop.eup %2734  ;;  %2754 = vrcp.f32 %v1412_v35  ;;  %v1413_v39 = vadd.f32 1.0, %v2733_v37  ;;  %v967_v47 = vadd.f32 %v966_v41, %v3457_v44  ;;  %v968_v48 = vpop.f32.mrb[55].mxu1 }
 0x275   : > { %v2737_v42 = vpop.eup %2736  ;;  %v1417_v43 = vadd.f32 1.0, %v2735_v38  ;;  %2756 = vpow2.f32 %v2245_v30  ;;  %v969_v50 = vadd.f32 %v968_v48, %v3462_v51 }
 0x276   : > { %v2739_v49 = vpop.eup %2738  ;;  %1974 = vst [vmem:[%s3384_s26 + $0x90] sm:$0xff] %v2737_v42  ;;  %2758 = vrcp.f32 %v1413_v39  ;;  %v2254_v55 = vmul.f32 -1.442695, %v967_v47 }
 0x277   : > { %v2741_v54 = vpop.eup %2740  ;;  %1978 = vst [vmem:[%s3384_s26 + $0xb0] sm:$0xff] %v2739_v49  ;;  %2760 = vrcp.f32 %v1417_v43  ;;  %v972_v28 = vpop.f32.mrb[56].mxu1  ;;  %v2255_v59 = vmul.f32 -1.442695, %v969_v50 }
 0x278   : > { %v2743_v56 = vpop.eup %2742  ;;  %1979 = vst [vmem:[%s3384_s26 + $0xb8] sm:$0xff] %v2741_v54  ;;  %2762 = vpow2.f32 %v2249_v40  ;;  %v973_v62 = vadd.f32 %v972_v28, %v3457_v44  ;;  %v974_v0 = vpop.f32.mrb[57].mxu1 }
 0x279   : > { %v2745_v57 = vpop.eup %2744  ;;  %v1418_v58 = vadd.f32 1.0, %v2743_v56  ;;  %2764 = vpow2.f32 %v2250_v46  ;;  %v975_v34 = vadd.f32 %v974_v0, %v3462_v51 }
 0x27a   : > { %v2747_v1 = vpop.eup %2746  ;;  %v1422_v8 = vadd.f32 1.0, %v2745_v57  ;;  %2766 = vpow2.f32 %v2254_v55  ;;  %v2259_v2 = vmul.f32 -1.442695, %v973_v62 }
 0x27b   : > { %v2749_v63 = vpop.eup %2748  ;;  %1983 = vst [vmem:[%s3384_s26 + $0xd8] sm:$0xff] %v2747_v1  ;;  %2768 = vrcp.f32 %v1418_v58  ;;  %v978_v53 = vpop.f32.mrb[58].mxu1  ;;  %v2260_v7 = vmul.f32 -1.442695, %v975_v34 }
 0x27c   : > { %v2751_v3 = vpop.eup %2750  ;;  %1984 = vst [vmem:[%s3384_s26 + $0xe0] sm:$0xff] %v2749_v63  ;;  %2770 = vrcp.f32 %v1422_v8  ;;  %v979_v9 = vadd.f32 %v978_v53, %v3457_v44  ;;  %v980_v60 = vpop.f32.mrb[59].mxu1 }
 0x27d   : > { %v2753_v5 = vpop.eup %2752  ;;  %v1423_v6 = vadd.f32 1.0, %v2751_v3  ;;  %2772 = vpow2.f32 %v2255_v59  ;;  %v981_v52 = vadd.f32 %v980_v60, %v3462_v51 }
 0x27e   : > { %v2755_v21 = vpop.eup %2754  ;;  %v1427_v45 = vadd.f32 1.0, %v2753_v5  ;;  %2774 = vpow2.f32 %v2259_v2  ;;  %v2264_v61 = vmul.f32 -1.442695, %v979_v9 }
 0x27f   : > { %v2757_v4 = vpop.eup %2756  ;;  %1988 = vst [vmem:[%s3384_s26 + $0x100] sm:$0xff] %v2755_v21  ;;  %2776 = vrcp.f32 %v1423_v6  ;;  %v2265_v13 = vmul.f32 -1.442695, %v981_v52  ;;  %v984_v12 = vpop.f32.mrb[60].mxu1 }
 0x280   : > { %v2759_v10 = vpop.eup %2758  ;;  %2778 = vrcp.f32 %v1427_v45  ;;  %v1428_v11 = vadd.f32 1.0, %v2757_v4  ;;  %v985_v15 = vadd.f32 %v984_v12, %v3457_v44  ;;  %v986_v16 = vpop.f32.mrb[61].mxu1 }
 0x281   : > { %v2761_v14 = vpop.eup %2760  ;;  %1989 = vst [vmem:[%s3384_s26 + $0x108] sm:$0xff] %v2759_v10  ;;  %2780 = vpow2.f32 %v2260_v7  ;;  %v987_v18 = vadd.f32 %v986_v16, %v3462_v51 }
 0x282   : > { %v2763_v17 = vpop.eup %2762  ;;  %1993 = vst [vmem:[%s3384_s26 + $0x128] sm:$0xff] %v2761_v14  ;;  %2782 = vrcp.f32 %v1428_v11  ;;  %v2269_v24 = vmul.f32 -1.442695, %v985_v15 }
 0x283   : > { %v2765_v19 = vpop.eup %2764  ;;  %v1432_v20 = vadd.f32 1.0, %v2763_v17  ;;  %2784 = vpow2.f32 %v2264_v61  ;;  %v990_v25 = vpop.f32.mrb[62].mxu1  ;;  %v2270_v29 = vmul.f32 -1.442695, %v987_v18 }
 0x284   : > { %v2767_v22 = vpop.eup %2766  ;;  %v1433_v23 = vadd.f32 1.0, %v2765_v19  ;;  %2786 = vpow2.f32 %v2265_v13  ;;  %v991_v30 = vadd.f32 %v990_v25, %v3457_v44  ;;  %v992_v31 = vpop.f32.mrb[63].mxu1 }
 0x285   : > { %v2769_v26 = vpop.eup %2768  ;;  %2788 = vrcp.f32 %v1432_v20  ;;  %v1437_v27 = vadd.f32 1.0, %v2767_v22  ;;  %v993_v33 = vadd.f32 %v992_v31, %v3462_v51 }
 0x286   : > { %v2771_v32 = vpop.eup %2770  ;;  %1994 = vst [vmem:[%s3384_s26 + $0x130] sm:$0xff] %v2769_v26  ;;  %2790 = vrcp.f32 %v1433_v23  ;;  %v2274_v38 = vmul.f32 -1.442695, %v991_v30 }
 0x287   : > { %v2773_v35 = vpop.eup %2772  ;;  %1998 = vst [vmem:[%s3384_s26 + $0x150] sm:$0xff] %v2771_v32  ;;  %2792 = vrcp.f32 %v1437_v27  ;;  %v2275_v44 = vmul.f32 -1.442695, %v993_v33 }
 0x288   : > { %v2775_v36 = vpop.eup %2774  ;;  %v1438_v37 = vadd.f32 1.0, %v2773_v35  ;;  %2794 = vpow2.f32 %v2269_v24 }
 0x289   : > { %v2777_v39 = vpop.eup %2776  ;;  %v1442_v40 = vadd.f32 1.0, %v2775_v36  ;;  %2796 = vpow2.f32 %v2270_v29 }
 0x28a   : > { %v2779_v41 = vpop.eup %2778  ;;  %1999 = vst [vmem:[%s3384_s26 + $0x158] sm:$0xff] %v2777_v39  ;;  %2798 = vrcp.f32 %v1438_v37 }
 0x28b   : > { %v2781_v42 = vpop.eup %2780  ;;  %2003 = vst [vmem:[%s3384_s26 + $0x178] sm:$0xff] %v2779_v41  ;;  %2800 = vrcp.f32 %v1442_v40 }
 0x28c   : > { %v2783_v51 = vpop.eup %2782  ;;  %v1443_v43 = vadd.f32 1.0, %v2781_v42  ;;  %2802 = vpow2.f32 %v2274_v38 }
 0x28d   : > { %v2785_v46 = vpop.eup %2784  ;;  %2004 = vst [vmem:[%s3384_s26 + $0x180] sm:$0xff] %v2783_v51  ;;  %2804 = vpow2.f32 %v2275_v44 }
 0x28e   : > { %v2787_v47 = vpop.eup %2786  ;;  %2806 = vrcp.f32 %v1443_v43  ;;  %v1447_v48 = vadd.f32 1.0, %v2785_v46 }
 0x28f   : > { %v2789_v49 = vpop.eup %2788  ;;  %v1448_v50 = vadd.f32 1.0, %v2787_v47 }
 0x290   : > { %v2791_v54 = vpop.eup %2790  ;;  %2008 = vst [vmem:[%s3384_s26 + $0x1a0] sm:$0xff] %v2789_v49  ;;  %2808 = vrcp.f32 %v1447_v48 }
 0x291   : > { %v2793_v55 = vpop.eup %2792  ;;  %2009 = vst [vmem:[%s3384_s26 + $0x1a8] sm:$0xff] %v2791_v54  ;;  %2810 = vrcp.f32 %v1448_v50 }
 0x292   : > { %v2795_v56 = vpop.eup %2794  ;;  %2013 = vst [vmem:[%s3384_s26 + $0x1c8] sm:$0xff] %v2793_v55 }
 0x293   : > { %v2797_v28 = vpop.eup %2796  ;;  %v1452_v57 = vadd.f32 1.0, %v2795_v56 }
 0x294   : > { %v2799_v58 = vpop.eup %2798  ;;  %v1453_v59 = vadd.f32 1.0, %v2797_v28 }
 0x295   : > { %v2801_v62 = vpop.eup %2800  ;;  %2014 = vst [vmem:[%s3384_s26 + $0x1d0] sm:$0xff] %v2799_v58  ;;  %2812 = vrcp.f32 %v1452_v57 }
 0x296   : > { %v2803_v0 = vpop.eup %2802  ;;  %2018 = vst [vmem:[%s3384_s26 + $0x1f0] sm:$0xff] %v2801_v62  ;;  %2814 = vrcp.f32 %v1453_v59 }
 0x297   : > { %v2805_v1 = vpop.eup %2804  ;;  %v1457_v8 = vadd.f32 1.0, %v2803_v0 }
 0x298   : > { %v2807_v34 = vpop.eup %2806  ;;  %v1458_v63 = vadd.f32 1.0, %v2805_v1 }
 0x299   : > { %2019 = vst [vmem:[%s3384_s26 + $0x1f8] sm:$0xff] %v2807_v34  ;;  %2816 = vrcp.f32 %v1457_v8 }
 0x29a   : > { %v2809_v2 = vpop.eup %2808  ;;  %2818 = vrcp.f32 %v1458_v63 }
 0x29b   : > { %v2811_v3 = vpop.eup %2810  ;;  %2023 = vst [vmem:[%s3384_s26 + $0x218] sm:$0xff] %v2809_v2 }
 0x29c   : > { %2024 = vst [vmem:[%s3384_s26 + $0x220] sm:$0xff] %v2811_v3 }
 0x29f   : > { %v2813_v53 = vpop.eup %2812 }
 0x2a0   : > { %v2815_v5 = vpop.eup %2814  ;;  %2028 = vst [vmem:[%s3384_s26 + $0x240] sm:$0xff] %v2813_v53 }
 0x2a1   : > { %2029 = vst [vmem:[%s3384_s26 + $0x248] sm:$0xff] %v2815_v5 }
 0x2a3   : > { %v2817_v6 = vpop.eup %2816 }
 0x2a4   : > { %v2819_v7 = vpop.eup %2818  ;;  %2033 = vst [vmem:[%s3384_s26 + $0x268] sm:$0xff] %v2817_v6 }
 0x2a5   : > { %2034 = vst [vmem:[%s3384_s26 + $0x270] sm:$0xff] %v2819_v7 }
 0x2a6   : > { %2861 = shalt.err (!%p2858_p7)
}
 0x2a7   : > { %s2862_s9 = scalar_lea.hbm %s3555_s16, 10240  ;;  %s2866_s19 = scalar_lea.hbm %s3610_s6, 20480 }
 0x2a8   : > { %p2863_p8 = scmp.ne.s32.totalorder %s3555_s16, %s2862_s9  ;;  %p2867_p1 = scmp.lt.u32.totalorder %s3555_s16, %s3610_s6 }
 0x2a9   : > { %p2868_p0 = scmp.lt.u32.totalorder %s2866_s19, %s2862_s9  ;;  %p2870_p6 = scmp.lt.u32.totalorder %s2862_s9, %s3555_s16 }
 0x2aa   : > { %p2864_p11 = pnand %p2863_p8, %p3621_p9 }
 0x2ab   : > { %p2869_p5 = por %p2868_p0, %p2867_p1 }
 0x2ac   : > { %p2865_p13 = pneg %p2864_p11 }
 0x2ad   : > { %p2871_p10 = por %p2870_p6, %p2869_p5 }
 0x2af   : > { %p2872_p12 = pnand %p2871_p10, %p2865_p13 }
 0x2b1   : > { %2875 = shalt.err (!%p2872_p12)
}
 0x2b2   : > { %s2921_s28 = smov 640   ;;  %s2922_s29 = smov 40  }
 0x2b3   : > { %2513 = dma.vmem_to_hbm [thread:$0]  (%p3621_p9), %s3557_s17, 10240, %s3555_s16, %s3563_s25, %s2921_s28, %s2921_s28, %s2922_s29  }
 0x2b4 PF: > { %p2525_p2 = scmp.ge.s32.totalorder %s2914_s24, 2  ;;  %s2066_s10 = sand.u32 1, %s2902_s21  }
 0x2b5   : > { %p3622_p3 = scmp.ne.s32.totalorder %s3615_s8, 0  ;;  %s2067_s14 = scalar_lea.sflag [#allocation4], %s2066_s10 }
 0x2b7   : > { %p2520_p4 = pnand %p2525_p2, %p3622_p3 }
 0x2b9   : > { %2897 = dma.done.wait (!%p2520_p4), %s2067_s14, 10240  }
 0x2ba   : > { %2899 = vsyncadd (!%p2520_p4), %s2067_s14, 4294957056  ;;  %p17_p7 = scmp.ge.s32.totalorder %s2983_s27, 4   ;;  %s3623_s21 = smov %s2906_s22 }
 0x2bb   : > { %s3624_s22 = smov %s2910_s23  ;;  %s3625_s23 = smov %s2994_s30 }
 0x2bc   : > { %s3626_s24 = smov %s2983_s27  ;;  %19 = sbr.rel (!%p17_p7) target bundleno = 4 (0x4), region = 87 }
 0x2c3   :  { %2072 = vsyncpa [#allocation3], 1 }
 0x2c4   :  { %2074 = vsyncpa [#allocation3 + $0x1], 1 }
 0x2c5   :  { %2075 = vsyncpa [#allocation4], 1 }
 0x2c6   :  { %2077 = vsyncpa [#allocation4 + $0x1], 1 }

</bundles_post_ra>
